<compile_context>
chip_gen: v6e
topology: v6e:2x2x1
jax: 0.10.0
libtpu: 0.0.40
codegen_flags: <defaults>
</compile_context>

<pallas_src>
import jax
import jax.numpy as jnp
from jax.experimental import pallas as pl
from jax.experimental.pallas import tpu as pltpu


# ------------------------------ kernel ------------------------------------

def _make_kernel(H, W, Cin, Cout, width, TH):
    """Builds the fused bottleneck kernel for fixed static shapes."""

    def kernel(x_ref, w1_ref, b1_ref, w2_ref, b2_ref, w3_ref, b3_ref,
               o_ref, patch_ref):
        # x_ref : (1, H+2, W, Cin)  zero-row-padded image, VMEM-resident
        # w1_ref: (Cin, width)      conv1 1x1 weight * bn1 scale (bf16)
        # w2_ref: (9*width, width)  conv2 3x3 weight * bn2 scale, im2col (bf16)
        # w3_ref: (width, Cout)     conv3 1x1 weight * bn3 scale (bf16)
        # b*_ref: (1, C)            folded BatchNorm biases (f32)
        # o_ref : (1, TH, W, Cout)  output row tile
        # patch_ref: (TH*W, 9*width) bf16 im2col scratch
        h = pl.program_id(1)
        n_tiles = pl.num_programs(1)
        r0 = pl.multiple_of(h * TH, TH)

        # Rows [r0, r0+TH+2) of the padded image: 1-row halo above, the TH
        # output rows, 1-row halo below — a single contiguous slice.
        x_ext = x_ref[0, pl.ds(r0, TH + 2), :, :]                   # (TH+2, W, Cin)

        # ---- conv1 (1x1, BN scale folded) + bias + ReLU -------------------
        h1 = jnp.dot(x_ext.reshape((TH + 2) * W, Cin).astype(jnp.bfloat16),
                     w1_ref[...], preferred_element_type=jnp.float32)
        h1 = jnp.maximum(h1 + b1_ref[...], 0.0).reshape(TH + 2, W, width)

        # conv2 zero padding lives in h1-space: halo rows that fall outside
        # the image must be zero (the padded x rows are zero, but conv1's
        # bias makes h1 nonzero there).  (TH+2, 1, 1) row mask, broadcast.
        row = jax.lax.broadcasted_iota(jnp.int32, (TH + 2, 1, 1), 0)
        keep = jnp.logical_and(jnp.logical_or(row > 0, h > 0),
                               jnp.logical_or(row < TH + 1, h < n_tiles - 1))
        h1 = jnp.where(keep, h1, 0.0).astype(jnp.bfloat16)

        # ---- conv2 (3x3, pad=1) as one im2col matmul, K = 9*width ---------
        # 9 shifted taps are written into the VMEM scratch with static
        # column slices (no lane-axis concatenate of the taps).
        zcol = jnp.zeros((TH + 2, 1, width), jnp.bfloat16)
        h1e = jnp.concatenate([zcol, h1, zcol], axis=1)             # (TH+2, W+2, width)
        for t in range(9):
            dy, dx = divmod(t, 3)
            tap = h1e[dy:dy + TH, dx:dx + W, :].reshape(TH * W, width)
            patch_ref[:, t * width:(t + 1) * width] = tap
        h2 = jnp.dot(patch_ref[...], w2_ref[...],
                     preferred_element_type=jnp.float32)
        h2 = jnp.maximum(h2 + b2_ref[...], 0.0)

        # ---- conv3 (1x1) + bias + residual + ReLU --------------------------
        h3 = jnp.dot(h2.astype(jnp.bfloat16), w3_ref[...],
                     preferred_element_type=jnp.float32) + b3_ref[...]
        x_mid = x_ref[0, pl.ds(r0 + 1, TH), :, :].reshape(TH * W, Cin)
        out = jnp.maximum(h3 + x_mid, 0.0)                          # Cin == Cout
        o_ref[0] = out.reshape(TH, W, Cout).astype(o_ref.dtype)

    return kernel


# --------------------------- sizing helpers --------------------------------

def _vmem_budget_bytes():
    """Per-chip scoped-VMEM budget with ~25% headroom for compiler scratch."""
    cap = 64 * 1024 * 1024            # conservative fallback (v7x physical)
    try:
        cap = int(pltpu.get_tpu_info().vmem_capacity_bytes)
    except Exception:
        pass
    # v5e/v6e (128 MiB) -> 96 MiB ; v7x (64 MiB) -> 48 MiB
    return min((cap * 3) // 4, 100 * 1024 * 1024)


def _bytes_needed(row_tile, H, W, Cin, Cout, width):
    m = row_tile * W
    image = 2 * (H + 2) * W * Cin * 4                  # resident padded image
    weights = (Cin * width + 9 * width * width + width * Cout) * 2 \
        + (2 * width + Cout) * 4
    patch = m * 9 * width * 2                          # im2col scratch (bf16)
    out_tile = 2 * m * Cout * 4                        # double-buffered output
    temps = 8 * (row_tile + 2) * W * width * 4         # h1/h1e/h2/tap headroom
    return image + weights + patch + out_tile + temps + (4 << 20)


def _pick_row_tile(H, W, Cin, Cout, width, budget):
    """Largest divisor of H whose working set fits the VMEM budget.

    Prefer multiples of 8 (sublane-aligned row slices); row_tile == H is
    always admissible.  Bigger tiles amortize the ~0.35 us per-grid-step
    overhead and the 2-halo-row conv1 recompute.
    """
    cands = [d for d in range(1, H + 1)
             if H % d == 0 and (d % 8 == 0 or d == H)]
    fits = [d for d in cands
            if _bytes_needed(d, H, W, Cin, Cout, width) <= budget]
    return max(fits) if fits else min(cands)


# ------------------------------ wrappers ------------------------------------

def bottleneck2d_pallas_nhwc(x_nhwc, params, *, row_tile=None):
    """x_nhwc: (N, H, W, Cin) float32. Returns (N, H, W, Cout)."""
    (w1, b1, w2, b2, w3, b3) = params
    N, H, W, Cin = x_nhwc.shape
    width = w1.shape[1]
    Cout = w3.shape[1]
    assert Cin == Cout, "identity add requires in_channels == out_channels*4"

    budget = _vmem_budget_bytes()
    if row_tile is None:
        row_tile = _pick_row_tile(H, W, Cin, Cout, width, budget)
    assert H % row_tile == 0, (H, row_tile)

    # One zero row above/below so the conv2 halo is a single contiguous
    # in-kernel slice (padding semantics themselves are applied to h1 via the
    # in-kernel row mask, not to x).
    x_pad = jnp.pad(x_nhwc, ((0, 0), (1, 1), (0, 0), (0, 0)))

    grid = (N, H // row_tile)

    def const(shape):
        return pl.BlockSpec(shape, lambda n, h: (0,) * len(shape))

    kernel = _make_kernel(H, W, Cin, Cout, width, row_tile)

    return pl.pallas_call(
        kernel,
        out_shape=jax.ShapeDtypeStruct((N, H, W, Cout), x_nhwc.dtype),
        grid_spec=pltpu.PrefetchScalarGridSpec(
            num_scalar_prefetch=0,
            grid=grid,
            in_specs=[
                # Full padded image; block index constant along the row axis,
                # so Pallas keeps it resident (no re-fetch across the sweep).
                pl.BlockSpec((1, H + 2, W, Cin), lambda n, h: (n, 0, 0, 0)),
                const((Cin, width)), const((1, width)),      # w1*s1 (bf16), b1
                const((9 * width, width)), const((1, width)),  # w2*s2 im2col, b2
                const((width, Cout)), const((1, Cout)),       # w3*s3 (bf16), b3
            ],
            out_specs=pl.BlockSpec((1, row_tile, W, Cout),
                                   lambda n, h: (n, h, 0, 0)),
            scratch_shapes=[pltpu.VMEM((row_tile * W, 9 * width), jnp.bfloat16)],
        ),
        compiler_params=pltpu.CompilerParams(
            # Batch axis parallel (v7x megacore splits there; each core keeps
            # its own resident image), row axis sequential.
            dimension_semantics=("parallel", "arbitrary"),
            vmem_limit_bytes=int(budget)),
    )(x_pad, w1, b1, w2, b2, w3, b3)


def bottleneck2d_pallas(x_nchw, params, *, row_tile=None):
    """PyTorch-layout wrapper: (N, Cin, H, W) -> (N, Cout, H, W)."""
    # TODO(synk): for real ResNet stacks keep the network in NHWC and call
    # bottleneck2d_pallas_nhwc directly to avoid the two HBM transposes.
    x_nhwc = jnp.transpose(x_nchw, (0, 2, 3, 1))
    out_nhwc = bottleneck2d_pallas_nhwc(x_nhwc, params, row_tile=row_tile)
    return jnp.transpose(out_nhwc, (0, 3, 1, 2))


# -------------------- parameter setup (deterministic) ----------------------

def make_params(key, in_channels, out_channels, base_channels=64, groups=1,
                expansion=4, eps=1e-5):
    width = int(out_channels * (base_channels / 64.0)) * groups
    cout = out_channels * expansion
    ks = jax.random.split(key, 6)

    def bn(k, c):
        k1, k2, k3, k4 = jax.random.split(k, 4)
        gamma = jax.random.uniform(k1, (c,), jnp.float32, 0.5, 1.5)
        beta = jax.random.normal(k2, (c,), jnp.float32) * 0.1
        mean = jax.random.normal(k3, (c,), jnp.float32) * 0.1
        var = jax.random.uniform(k4, (c,), jnp.float32, 0.5, 1.5)
        scale = gamma / jnp.sqrt(var + eps)
        bias = beta - mean * scale
        return scale, bias

    # PyTorch conv weights are OIHW.
    w1_oihw = jax.random.normal(ks[0], (width, in_channels, 1, 1), jnp.float32) * 0.1
    w2_oihw = jax.random.normal(ks[1], (width, width, 3, 3), jnp.float32) * 0.1
    w3_oihw = jax.random.normal(ks[2], (cout, width, 1, 1), jnp.float32) * 0.1
    s1, b1 = bn(ks[3], width)
    s2, b2 = bn(ks[4], width)
    s3, b3 = bn(ks[5], cout)

    # Inference-mode BN: fold the per-output-channel scale into the conv
    # weight in f32, then cast to bf16; only the bias-add stays in-kernel.
    w1f = w1_oihw * s1.reshape(width, 1, 1, 1)
    w2f = w2_oihw * s2.reshape(width, 1, 1, 1)
    w3f = w3_oihw * s3.reshape(cout, 1, 1, 1)

    kernel_params = (
        jnp.transpose(w1f[:, :, 0, 0], (1, 0)).astype(jnp.bfloat16),   # (Cin, width)
        b1.reshape(1, width),
        jnp.transpose(w2f, (2, 3, 1, 0))                               # (kh, kw, in, out)
           .reshape(9 * width, width).astype(jnp.bfloat16),            # im2col layout
        b2.reshape(1, width),
        jnp.transpose(w3f[:, :, 0, 0], (1, 0)).astype(jnp.bfloat16),   # (width, Cout)
        b3.reshape(1, cout),
    )
    ref_params = (w1f, b1, w2f, b2, w3f, b3)
    return kernel_params, ref_params


def reference(x, ref_params):
    """Same math as the kernel: BN scale folded into f32 weights, bf16 conv
    operands, f32 accumulation / element-wise, identical weight values."""
    (w1, b1, w2, b2, w3, b3) = ref_params

    def conv(t, w, pad):
        return jax.lax.conv_general_dilated(
            t.astype(jnp.bfloat16), w.astype(jnp.bfloat16),
            window_strides=(1, 1), padding=[(pad, pad), (pad, pad)],
            dimension_numbers=('NCHW', 'OIHW', 'NCHW'),
            preferred_element_type=jnp.float32)

    def bias(t, b):
        return t + b.reshape(1, -1, 1, 1)

    out = jax.nn.relu(bias(conv(x, w1, 0), b1))
    out = jax.nn.relu(bias(conv(out, w2, 1), b2))
    out = bias(conv(out, w3, 0), b3)
    return jax.nn.relu(out + x)


if __name__ == "__main__":
    key = jax.random.PRNGKey(0)
    in_channels, out_channels = 64, 16        # width = 16, Cout = 64 == Cin
    N, H, W = 2, 16, 16

    kx, kp = jax.random.split(key)
    x = jax.random.normal(kx, (N, in_channels, H, W), jnp.float32)
    kernel_params, ref_params = make_params(kp, in_channels, out_channels)

    # row_tile=8 -> 2 row tiles per image, exercising both the boundary and
    # the interior halo/mask paths.
    out = bottleneck2d_pallas(x, kernel_params, row_tile=8)
    out = jax.block_until_ready(out)

    ref = reference(x, ref_params)
    assert out.shape == ref.shape == (N, in_channels, H, W)
    err = float(jnp.max(jnp.abs(out - ref)))
    assert jnp.allclose(out, ref, atol=3e-3, rtol=3e-3), err

    # Also exercise the budget-driven row-tile picker once.
    out2 = bottleneck2d_pallas(x, kernel_params)
    out2 = jax.block_until_ready(out2)
    assert jnp.allclose(out2, ref, atol=3e-3, rtol=3e-3)

    print("KERNEL_OK")
</pallas_src>

<mosaic_0001>
module attributes {stable_mosaic.version = 11 : i64} {
  func.func @kernel(%arg0: i32, %arg1: i32, %arg2: memref<1x18x16x64xf32, #tpu.memory_space<vmem>>, %arg3: memref<64x16xbf16, #tpu.memory_space<vmem>>, %arg4: memref<1x16xf32, #tpu.memory_space<vmem>>, %arg5: memref<144x16xbf16, #tpu.memory_space<vmem>>, %arg6: memref<1x16xf32, #tpu.memory_space<vmem>>, %arg7: memref<16x64xbf16, #tpu.memory_space<vmem>>, %arg8: memref<1x64xf32, #tpu.memory_space<vmem>>, %arg9: memref<1x8x16x64xf32, #tpu.memory_space<vmem>>, %arg10: memref<128x144xbf16, #tpu.memory_space<vmem>>) attributes {dimension_semantics = [#tpu.dimension_semantics<parallel>, #tpu.dimension_semantics<arbitrary>], iteration_bounds = array<i64: 2, 2>, scalar_prefetch = 0 : i64, scratch_operands = 1 : i64, tpu.core_type = #tpu.core_type<tc>, window_params = [{transform_indices = @transform_0, window_bounds = array<i64: 1, 18, 16, 64>}, {pipeline_mode = #tpu.pipeline_mode<synchronous>, transform_indices = @transform_1, window_bounds = array<i64: 64, 16>}, {pipeline_mode = #tpu.pipeline_mode<synchronous>, transform_indices = @transform_2, window_bounds = array<i64: 1, 16>}, {pipeline_mode = #tpu.pipeline_mode<synchronous>, transform_indices = @transform_3, window_bounds = array<i64: 144, 16>}, {pipeline_mode = #tpu.pipeline_mode<synchronous>, transform_indices = @transform_4, window_bounds = array<i64: 1, 16>}, {pipeline_mode = #tpu.pipeline_mode<synchronous>, transform_indices = @transform_5, window_bounds = array<i64: 16, 64>}, {pipeline_mode = #tpu.pipeline_mode<synchronous>, transform_indices = @transform_6, window_bounds = array<i64: 1, 64>}, {transform_indices = @transform_7, window_bounds = array<i64: 1, 8, 16, 64>}]} {
    %c8_i32 = arith.constant 8 : i32
    %0 = arith.muli %arg1, %c8_i32 : i32
    %1 = tpu.assume_multiple %0, 8 : i32
    %c0 = arith.constant 0 : index
    %2 = arith.index_cast %1 : i32 to index
    %c0_0 = arith.constant 0 : index
    %c0_1 = arith.constant 0 : index
    %3 = vector.load %arg2[%c0, %2, %c0_0, %c0_1] : memref<1x18x16x64xf32, #tpu.memory_space<vmem>>, vector<1x10x16x64xf32>
    %4 = vector.shape_cast %3 : vector<1x10x16x64xf32> to vector<10x16x64xf32>
    %5 = vector.shape_cast %4 : vector<10x16x64xf32> to vector<160x64xf32>
    %6 = arith.truncf %5 : vector<160x64xf32> to vector<160x64xbf16>
    %c0_2 = arith.constant 0 : index
    %c0_3 = arith.constant 0 : index
    %7 = vector.load %arg3[%c0_2, %c0_3] : memref<64x16xbf16, #tpu.memory_space<vmem>>, vector<64x16xbf16>
    %cst = arith.constant dense<0.000000e+00> : vector<160x16xf32>
    %8 = tpu.matmul %6, %7, %cst {dimension_numbers = #tpu.dot_dimension_numbers<[1], [0], [0], [1], [0, 0, 1, 1], [], []>} : vector<160x64xbf16>, vector<64x16xbf16>, vector<160x16xf32> -> vector<160x16xf32>
    %c0_4 = arith.constant 0 : index
    %c0_5 = arith.constant 0 : index
    %9 = vector.load %arg4[%c0_4, %c0_5] : memref<1x16xf32, #tpu.memory_space<vmem>>, vector<1x16xf32>
    %10 = vector.broadcast %9 : vector<1x16xf32> to vector<160x16xf32>
    %11 = arith.addf %8, %10 : vector<160x16xf32>
    %cst_6 = arith.constant 0.000000e+00 : f32
    %12 = vector.broadcast %cst_6 : f32 to vector<160x16xf32>
    %13 = arith.maximumf %11, %12 : vector<160x16xf32>
    %14 = vector.shape_cast %13 : vector<160x16xf32> to vector<10x16x16xf32>
    %15 = tpu.iota {dimensions = array<i32: 0>} : vector<10x1x1xi32>
    %c0_i32 = arith.constant 0 : i32
    %16 = vector.broadcast %c0_i32 : i32 to vector<10x1x1xi32>
    %17 = arith.cmpi sgt, %15, %16 : vector<10x1x1xi32>
    %c0_i32_7 = arith.constant 0 : i32
    %18 = arith.cmpi sgt, %arg1, %c0_i32_7 : i32
    %19 = vector.broadcast %18 : i1 to vector<10x1x1xi1>
    %20 = arith.ori %17, %19 : vector<10x1x1xi1>
    %c9_i32 = arith.constant 9 : i32
    %21 = vector.broadcast %c9_i32 : i32 to vector<10x1x1xi32>
    %22 = arith.cmpi slt, %15, %21 : vector<10x1x1xi32>
    %c1_i32 = arith.constant 1 : i32
    %23 = arith.cmpi slt, %arg1, %c1_i32 : i32
    %24 = vector.broadcast %23 : i1 to vector<10x1x1xi1>
    %25 = arith.ori %22, %24 : vector<10x1x1xi1>
    %26 = arith.andi %20, %25 : vector<10x1x1xi1>
    %cst_8 = arith.constant 0.000000e+00 : f32
    %27 = vector.shape_cast %26 : vector<10x1x1xi1> to vector<10x1x1xi1>
    %28 = vector.broadcast %27 : vector<10x1x1xi1> to vector<10x16x16xi1>
    %29 = vector.broadcast %cst_8 : f32 to vector<10x16x16xf32>
    %30 = arith.select %28, %14, %29 : vector<10x16x16xi1>, vector<10x16x16xf32>
    %31 = arith.truncf %30 : vector<10x16x16xf32> to vector<10x16x16xbf16>
    %cst_9 = arith.constant 0.000000e+00 : bf16
    %32 = vector.broadcast %cst_9 : bf16 to vector<10x1x16xbf16>
    %33 = tpu.concatenate %32, %31, %32 in 1 : vector<10x1x16xbf16>, vector<10x16x16xbf16>, vector<10x1x16xbf16> -> vector<10x18x16xbf16>
    %34 = vector.extract_strided_slice %33 {offsets = [0, 0, 0], sizes = [8, 16, 16], strides = [1, 1, 1]} : vector<10x18x16xbf16> to vector<8x16x16xbf16>
    %35 = vector.shape_cast %34 : vector<8x16x16xbf16> to vector<128x16xbf16>
    %c0_10 = arith.constant 0 : index
    %c0_11 = arith.constant 0 : index
    %36 = vector.load %arg10[%c0_10, %c0_11] : memref<128x144xbf16, #tpu.memory_space<vmem>>, vector<128x16xbf16>
    tpu.vector_store %arg10[%c0_10, %c0_11], %35 {strides = array<i32>} : memref<128x144xbf16, #tpu.memory_space<vmem>>, vector<128x16xbf16>,
    %37 = vector.extract_strided_slice %33 {offsets = [0, 1, 0], sizes = [8, 16, 16], strides = [1, 1, 1]} : vector<10x18x16xbf16> to vector<8x16x16xbf16>
    %38 = vector.shape_cast %37 : vector<8x16x16xbf16> to vector<128x16xbf16>
    %c0_12 = arith.constant 0 : index
    %c16 = arith.constant 16 : index
    %39 = vector.load %arg10[%c0_12, %c16] : memref<128x144xbf16, #tpu.memory_space<vmem>>, vector<128x16xbf16>
    tpu.vector_store %arg10[%c0_12, %c16], %38 {strides = array<i32>} : memref<128x144xbf16, #tpu.memory_space<vmem>>, vector<128x16xbf16>,
    %40 = vector.extract_strided_slice %33 {offsets = [0, 2, 0], sizes = [8, 16, 16], strides = [1, 1, 1]} : vector<10x18x16xbf16> to vector<8x16x16xbf16>
    %41 = vector.shape_cast %40 : vector<8x16x16xbf16> to vector<128x16xbf16>
    %c0_13 = arith.constant 0 : index
    %c32 = arith.constant 32 : index
    %42 = vector.load %arg10[%c0_13, %c32] : memref<128x144xbf16, #tpu.memory_space<vmem>>, vector<128x16xbf16>
    tpu.vector_store %arg10[%c0_13, %c32], %41 {strides = array<i32>} : memref<128x144xbf16, #tpu.memory_space<vmem>>, vector<128x16xbf16>,
    %43 = vector.extract_strided_slice %33 {offsets = [1, 0, 0], sizes = [8, 16, 16], strides = [1, 1, 1]} : vector<10x18x16xbf16> to vector<8x16x16xbf16>
    %44 = vector.shape_cast %43 : vector<8x16x16xbf16> to vector<128x16xbf16>
    %c0_14 = arith.constant 0 : index
    %c48 = arith.constant 48 : index
    %45 = vector.load %arg10[%c0_14, %c48] : memref<128x144xbf16, #tpu.memory_space<vmem>>, vector<128x16xbf16>
    tpu.vector_store %arg10[%c0_14, %c48], %44 {strides = array<i32>} : memref<128x144xbf16, #tpu.memory_space<vmem>>, vector<128x16xbf16>,
    %46 = vector.extract_strided_slice %33 {offsets = [1, 1, 0], sizes = [8, 16, 16], strides = [1, 1, 1]} : vector<10x18x16xbf16> to vector<8x16x16xbf16>
    %47 = vector.shape_cast %46 : vector<8x16x16xbf16> to vector<128x16xbf16>
    %c0_15 = arith.constant 0 : index
    %c64 = arith.constant 64 : index
    %48 = vector.load %arg10[%c0_15, %c64] : memref<128x144xbf16, #tpu.memory_space<vmem>>, vector<128x16xbf16>
    tpu.vector_store %arg10[%c0_15, %c64], %47 {strides = array<i32>} : memref<128x144xbf16, #tpu.memory_space<vmem>>, vector<128x16xbf16>,
    %49 = vector.extract_strided_slice %33 {offsets = [1, 2, 0], sizes = [8, 16, 16], strides = [1, 1, 1]} : vector<10x18x16xbf16> to vector<8x16x16xbf16>
    %50 = vector.shape_cast %49 : vector<8x16x16xbf16> to vector<128x16xbf16>
    %c0_16 = arith.constant 0 : index
    %c80 = arith.constant 80 : index
    %51 = vector.load %arg10[%c0_16, %c80] : memref<128x144xbf16, #tpu.memory_space<vmem>>, vector<128x16xbf16>
    tpu.vector_store %arg10[%c0_16, %c80], %50 {strides = array<i32>} : memref<128x144xbf16, #tpu.memory_space<vmem>>, vector<128x16xbf16>,
    %52 = vector.extract_strided_slice %33 {offsets = [2, 0, 0], sizes = [8, 16, 16], strides = [1, 1, 1]} : vector<10x18x16xbf16> to vector<8x16x16xbf16>
    %53 = vector.shape_cast %52 : vector<8x16x16xbf16> to vector<128x16xbf16>
    %c0_17 = arith.constant 0 : index
    %c96 = arith.constant 96 : index
    %54 = vector.load %arg10[%c0_17, %c96] : memref<128x144xbf16, #tpu.memory_space<vmem>>, vector<128x16xbf16>
    tpu.vector_store %arg10[%c0_17, %c96], %53 {strides = array<i32>} : memref<128x144xbf16, #tpu.memory_space<vmem>>, vector<128x16xbf16>,
    %55 = vector.extract_strided_slice %33 {offsets = [2, 1, 0], sizes = [8, 16, 16], strides = [1, 1, 1]} : vector<10x18x16xbf16> to vector<8x16x16xbf16>
    %56 = vector.shape_cast %55 : vector<8x16x16xbf16> to vector<128x16xbf16>
    %c0_18 = arith.constant 0 : index
    %c112 = arith.constant 112 : index
    %57 = vector.load %arg10[%c0_18, %c112] : memref<128x144xbf16, #tpu.memory_space<vmem>>, vector<128x16xbf16>
    tpu.vector_store %arg10[%c0_18, %c112], %56 {strides = array<i32>} : memref<128x144xbf16, #tpu.memory_space<vmem>>, vector<128x16xbf16>,
    %58 = vector.extract_strided_slice %33 {offsets = [2, 2, 0], sizes = [8, 16, 16], strides = [1, 1, 1]} : vector<10x18x16xbf16> to vector<8x16x16xbf16>
    %59 = vector.shape_cast %58 : vector<8x16x16xbf16> to vector<128x16xbf16>
    %c0_19 = arith.constant 0 : index
    %c128 = arith.constant 128 : index
    %60 = vector.load %arg10[%c0_19, %c128] : memref<128x144xbf16, #tpu.memory_space<vmem>>, vector<128x16xbf16>
    tpu.vector_store %arg10[%c0_19, %c128], %59 {strides = array<i32>} : memref<128x144xbf16, #tpu.memory_space<vmem>>, vector<128x16xbf16>,
    %c0_20 = arith.constant 0 : index
    %c0_21 = arith.constant 0 : index
    %61 = vector.load %arg10[%c0_20, %c0_21] : memref<128x144xbf16, #tpu.memory_space<vmem>>, vector<128x144xbf16>
    %c0_22 = arith.constant 0 : index
    %c0_23 = arith.constant 0 : index
    %62 = vector.load %arg5[%c0_22, %c0_23] : memref<144x16xbf16, #tpu.memory_space<vmem>>, vector<144x16xbf16>
    %cst_24 = arith.constant dense<0.000000e+00> : vector<128x16xf32>
    %63 = tpu.matmul %61, %62, %cst_24 {dimension_numbers = #tpu.dot_dimension_numbers<[1], [0], [0], [1], [0, 0, 1, 1], [], []>} : vector<128x144xbf16>, vector<144x16xbf16>, vector<128x16xf32> -> vector<128x16xf32>
    %c0_25 = arith.constant 0 : index
    %c0_26 = arith.constant 0 : index
    %64 = vector.load %arg6[%c0_25, %c0_26] : memref<1x16xf32, #tpu.memory_space<vmem>>, vector<1x16xf32>
    %65 = vector.broadcast %64 : vector<1x16xf32> to vector<128x16xf32>
    %66 = arith.addf %63, %65 : vector<128x16xf32>
    %cst_27 = arith.constant 0.000000e+00 : f32
    %67 = vector.broadcast %cst_27 : f32 to vector<128x16xf32>
    %68 = arith.maximumf %66, %67 : vector<128x16xf32>
    %69 = arith.truncf %68 : vector<128x16xf32> to vector<128x16xbf16>
    %c0_28 = arith.constant 0 : index
    %c0_29 = arith.constant 0 : index
    %70 = vector.load %arg7[%c0_28, %c0_29] : memref<16x64xbf16, #tpu.memory_space<vmem>>, vector<16x64xbf16>
    %cst_30 = arith.constant dense<0.000000e+00> : vector<128x64xf32>
    %71 = tpu.matmul %69, %70, %cst_30 {dimension_numbers = #tpu.dot_dimension_numbers<[1], [0], [0], [1], [0, 0, 1, 1], [], []>} : vector<128x16xbf16>, vector<16x64xbf16>, vector<128x64xf32> -> vector<128x64xf32>
    %c0_31 = arith.constant 0 : index
    %c0_32 = arith.constant 0 : index
    %72 = vector.load %arg8[%c0_31, %c0_32] : memref<1x64xf32, #tpu.memory_space<vmem>>, vector<1x64xf32>
    %73 = vector.broadcast %72 : vector<1x64xf32> to vector<128x64xf32>
    %74 = arith.addf %71, %73 : vector<128x64xf32>
    %c1_i32_33 = arith.constant 1 : i32
    %75 = arith.addi %1, %c1_i32_33 : i32
    %c0_34 = arith.constant 0 : index
    %76 = arith.index_cast %75 : i32 to index
    %c0_35 = arith.constant 0 : index
    %c0_36 = arith.constant 0 : index
    %77 = vector.load %arg2[%c0_34, %76, %c0_35, %c0_36] : memref<1x18x16x64xf32, #tpu.memory_space<vmem>>, vector<1x8x16x64xf32>
    %78 = vector.shape_cast %77 : vector<1x8x16x64xf32> to vector<8x16x64xf32>
    %79 = vector.shape_cast %78 : vector<8x16x64xf32> to vector<128x64xf32>
    %80 = arith.addf %74, %79 : vector<128x64xf32>
    %cst_37 = arith.constant 0.000000e+00 : f32
    %81 = vector.broadcast %cst_37 : f32 to vector<128x64xf32>
    %82 = arith.maximumf %80, %81 : vector<128x64xf32>
    %83 = vector.shape_cast %82 : vector<128x64xf32> to vector<8x16x64xf32>
    %c0_38 = arith.constant 0 : index
    %c0_39 = arith.constant 0 : index
    %c0_40 = arith.constant 0 : index
    %c0_41 = arith.constant 0 : index
    %84 = vector.load %arg9[%c0_38, %c0_39, %c0_40, %c0_41] : memref<1x8x16x64xf32, #tpu.memory_space<vmem>>, vector<1x8x16x64xf32>
    %85 = vector.shape_cast %84 : vector<1x8x16x64xf32> to vector<8x16x64xf32>
    %86 = vector.shape_cast %83 : vector<8x16x64xf32> to vector<1x8x16x64xf32>
    tpu.vector_store %arg9[%c0_38, %c0_39, %c0_40, %c0_41], %86 {strides = array<i32>} : memref<1x8x16x64xf32, #tpu.memory_space<vmem>>, vector<1x8x16x64xf32>,
    return
  }
  func.func @transform_0(%arg0: i32, %arg1: i32) -> (i32, i32, i32, i32) {
    %c0_i32 = arith.constant 0 : i32
    %c0_i32_0 = arith.constant 0 : i32
    %c0_i32_1 = arith.constant 0 : i32
    %c0_i32_2 = arith.constant 0 : i32
    return %arg0, %c0_i32, %c0_i32_0, %c0_i32_1 : i32, i32, i32, i32
  }
  func.func @transform_1(%arg0: i32, %arg1: i32) -> (i32, i32) {
    %c0_i32 = arith.constant 0 : i32
    %c0_i32_0 = arith.constant 0 : i32
    %c0_i32_1 = arith.constant 0 : i32
    return %c0_i32, %c0_i32_0 : i32, i32
  }
  func.func @transform_2(%arg0: i32, %arg1: i32) -> (i32, i32) {
    %c0_i32 = arith.constant 0 : i32
    %c0_i32_0 = arith.constant 0 : i32
    %c0_i32_1 = arith.constant 0 : i32
    return %c0_i32, %c0_i32_0 : i32, i32
  }
  func.func @transform_3(%arg0: i32, %arg1: i32) -> (i32, i32) {
    %c0_i32 = arith.constant 0 : i32
    %c0_i32_0 = arith.constant 0 : i32
    %c0_i32_1 = arith.constant 0 : i32
    return %c0_i32, %c0_i32_0 : i32, i32
  }
  func.func @transform_4(%arg0: i32, %arg1: i32) -> (i32, i32) {
    %c0_i32 = arith.constant 0 : i32
    %c0_i32_0 = arith.constant 0 : i32
    %c0_i32_1 = arith.constant 0 : i32
    return %c0_i32, %c0_i32_0 : i32, i32
  }
  func.func @transform_5(%arg0: i32, %arg1: i32) -> (i32, i32) {
    %c0_i32 = arith.constant 0 : i32
    %c0_i32_0 = arith.constant 0 : i32
    %c0_i32_1 = arith.constant 0 : i32
    return %c0_i32, %c0_i32_0 : i32, i32
  }
  func.func @transform_6(%arg0: i32, %arg1: i32) -> (i32, i32) {
    %c0_i32 = arith.constant 0 : i32
    %c0_i32_0 = arith.constant 0 : i32
    %c0_i32_1 = arith.constant 0 : i32
    return %c0_i32, %c0_i32_0 : i32, i32
  }
  func.func @transform_7(%arg0: i32, %arg1: i32) -> (i32, i32, i32, i32) {
    %c0_i32 = arith.constant 0 : i32
    %c0_i32_0 = arith.constant 0 : i32
    %c0_i32_1 = arith.constant 0 : i32
    return %arg0, %arg1, %c0_i32, %c0_i32_0 : i32, i32, i32, i32
  }
}

</mosaic_0001>

<bundles_post_ra>
// kernel: tpu_custom_call.1
= control target key start
LH: loop header
LB: loop body
LE: loop exit
PB: predicated region body
PF: predicated region fallthrough
CT: control target
= control target key end

     0   :  { %12 = vsyncpa [#allocation4], 0  ;;  %s3764_s0 = inlined_call_operand.hbm [shape: f32[2,18,16,64], index: 0, kind: input, shape index: {}]   ;;  %s3765_s1 = inlined_call_operand.vmem [shape: bf16[64,16], index: 1, kind: input, shape index: {}]   ;;  %s3766_s2 = inlined_call_operand.vmem [shape: f32[1,16], index: 2, kind: input, shape index: {}]   ;;  %s3767_s3 = inlined_call_operand.vmem [shape: bf16[144,16], index: 3, kind: input, shape index: {}]   ;;  %s3768_s4 = inlined_call_operand.vmem [shape: f32[1,16], index: 4, kind: input, shape index: {}]   ;;  %s3769_s5 = inlined_call_operand.vmem [shape: bf16[16,64], index: 5, kind: input, shape index: {}]   ;;  %s3770_s6 = inlined_call_operand.vmem [shape: f32[1,64], index: 6, kind: input, shape index: {}]   ;;  %s3771_s7 = inlined_call_operand.hbm [shape: f32[2,16,16,64], index: 7, kind: output, shape index: {}]  }
   0x1   :  { %14 = vsyncpa [#allocation4 + $0x1], 0 }
   0x2   :  { %15 = vsyncpa [#allocation5], 0 }
   0x3   :  { %17 = vsyncpa [#allocation5 + $0x1], 0  ;;  %s2723_s24 = smov 0   ;;  %s2725_s25 = smov 0  }
   0x4   :  { %s2727_s26 = smov 0   ;;  %s2729_s27 = smov 0  }
   0x5   :  { %s2731_s28 = smov 0   ;;  %s2733_s29 = smov 0  }
   0x6   :  { %s2735_s30 = smov 0   ;;  %s2737_s8 = smov 0  }
   0x7   :  { %s2739_s9 = smov 0   ;;  %s2741_s10 = smov 0  }
   0x8   :  { %s2743_s11 = smov 0  }
   0x9 LB: > { %3778 = sst [smem:[#allocation9_spill]] %s2635_s26  ;;  %s2142_s12 = sadd.s32 4294967295, %s2667_s11   ;;  %s2667_s11 = sphi %s2743_s11, %s23_s11   ;;  %s2663_s10 = sphi %s2741_s10, %s3810_s10   ;;  %s2659_s9 = sphi %s2739_s9, %s3801_s9   ;;  %s2655_s8 = sphi %s2737_s8, %s3809_s8   ;;  %s2651_s30 = sphi %s2735_s30, %s3799_s30   ;;  %s2647_s29 = sphi %s2733_s29, %s3808_s29   ;;  %s2643_s28 = sphi %s2731_s28, %s3807_s28   ;;  %s2639_s27 = sphi %s2729_s27, %s3806_s27   ;;  %s2635_s26 = sphi %s2727_s26, %s3805_s26   ;;  %s2631_s25 = sphi %s2725_s25, %s3804_s25   ;;  %s2627_s24 = sphi %s2723_s24, %s3803_s24  }
   0xa   : > { %3779 = sst [smem:[#allocation10_spill]] %s2647_s29  ;;  %s2143_s13 = sadd.s32 4294967294, %s2667_s11  }
   0xb   : > { %3780 = sst [smem:[#allocation11_spill]] %s2659_s9  ;;  %s32_s14 = sadd.s32 1, %s2659_s9 }
   0xc   : > { %3781 = sst [smem:[#allocation12_spill]] %s2663_s10  ;;  %s35_s15 = sadd.s32 1, %s2663_s10 }
   0xd   : > { %p33_p0 = scmp.ge.s32.totalorder %s32_s14, 2  ;;  %s42_s16 = sadd.s32 1, %s2647_s29 }
   0xe   : > { %p49_p1 = scmp.ne.s32.totalorder %s2647_s29, %s2643_s28  ;;  %p50_p2 = scmp.eq.s32.totalorder %s2667_s11, 0 }
   0xf   : > { %s3812_s14 = smov (%p33_p0, %s32_s14), 0  ;;  %s3814_s15 = smov (!%p33_p0, %s35_s15), %s2663_s10 }
  0x10   : > { %3782 = sst [smem:[#allocation13_spill]] %s3812_s14  ;;  %p2787_p3 = por %p50_p2, %p49_p1 }
  0x11   : > { %p55_p4 = scmp.ne.s32.totalorder %s2643_s28, %s2639_s27  ;;  %p37_p5 = scmp.ge.s32.totalorder %s3814_s15, 2 }
  0x12   : > { %p56_p6 = scmp.eq.s32.totalorder %s2142_s12, 0  ;;  %s192_s18 = ssub.s32 %s2659_s9, %s3812_s14 }
  0x13   : > { %s196_s19 = sadd.s32 1, %s2635_s26  ;;  %s3816_s15 = smov (%p37_p5, %s3814_s15), 0 }
  0x14   : > { %3784 = sst [smem:[#allocation14_spill]] %s3816_s15  ;;  %p2797_p7 = por %p56_p6, %p55_p4 }
  0x15   : > { %p206_p8 = scmp.ne.s32.totalorder %s2635_s26, %s2631_s25  ;;  %s39_s21 = ssub.s32 %s2663_s10, %s3816_s15 }
  0x16   : > { %p207_p9 = scmp.eq.s32.totalorder %s2142_s12, 3  ;;  %p40_p10 = scmp.eq.s32.totalorder %s39_s21, 0 }
  0x17   : > { %s193_s22 = sor.u32 %s192_s18, %s39_s21  ;;  %p212_p13 = scmp.ne.s32.totalorder %s2631_s25, %s2627_s24 }
  0x18   : > { %p194_p11 = scmp.eq.s32.totalorder %s193_s22, 0  ;;  %p2805_p12 = por %p207_p9, %p206_p8 }
  0x19   : > { %s2810_s27 = scalar_select %p40_p10, %s2647_s29, %s42_s16  }
  0x1a   : > { %s2813_s14 = scalar_select %p194_p11, %s2635_s26, %s196_s19  }
  0x1b   : > { %3787 = sst [smem:[#allocation15_spill]] %s2810_s27  ;;  %p213_p0 = scmp.eq.s32.totalorder %s2143_s13, 3 }
  0x1c   : > { %3788 = sst [smem:[#allocation16_spill]] %s2813_s14  ;;  %p2382_p1 = scmp.lt.s32.totalorder %s2667_s11, 4 }
  0x1d   : > { %p2818_p2 = por %p213_p0, %p212_p13  ;;  %s251_s12 = sand.u32 1, %s2647_s29  }
  0x1e   : > { %s2367_s15 = smul.u32 288, %s251_s12  ;;  %p2826_p4 = pnand %p2382_p1, %p2787_p3 }
  0x1f   : > { %s2368_s18 = smul.u32 4608, %s2663_s10  ;;  %p2147_p5 = scmp.ge.s32.totalorder %s2667_s11, 1 }
  0x20   : > { %s255_s27 = scalar_lea.vmem [#allocation3], %s2367_s15  ;;  %s252_s14 = scalar_lea.sflag [#allocation4], %s251_s12 }
  0x21   : > { %s261_s19 = scalar_lea.hbm %s3764_s0, %s2368_s18  ;;  %s262_s13 = sshll.u32 %s255_s27, 4  ;;  %s263_s13 = int_to_ptr.vmem [resolvable:$true] %s262_s13 }
  0x22   : > { %p2521_p6 = pneg %p2826_p4  ;;  %s2532_s29 = scalar_lea.vmem %s263_s13, 4608 }
  0x23   : > { %p2533_p8 = scmp.ne.s32.totalorder %s263_s13, %s2532_s29  ;;  %s2669_s17 = smov [#allocation3]  }
  0x24   : > { %s2537_s10 = sshll.u32 %s2669_s17, 4  ;;  %s2538_s10 = int_to_ptr.vmem [resolvable:$false] %s2537_s10 }
  0x25   : > { %p2535_p9 = pnand %p2533_p8, %p2521_p6  ;;  %s2539_s26 = scalar_lea.vmem %s2538_s10, 9216 }
  0x26   : > { %p2540_p3 = scmp.lt.s32.totalorder %s263_s13, %s2538_s10  ;;  %p2541_p11 = scmp.lt.s32.totalorder %s2539_s26, %s2532_s29 }
  0x27   : > { %p2536_p10 = pneg %p2535_p9 }
  0x28   : > { %p2542_p13 = por %p2541_p11, %p2540_p3 }
  0x2a   : > { %p2543_p0 = pnand %p2542_p13, %p2536_p10 }
  0x2c   : > { %2546 = shalt.err (!%p2543_p0)
}
  0x2d   : > { %s2670_s15 = smov 128   ;;  %s2671_s27 = smov 8  }
  0x2e   : > { %2377 = dma.hbm_to_vmem [thread:$0]  (!%p2826_p4), %s261_s19, 4608, %s263_s13, %s252_s14, %s2670_s15, %s2670_s15, %s2671_s27  }
  0x2f   : > { %p270_p1 = scmp.lt.s32.totalorder %s2667_s11, 5 }
  0x31   : > { %p271_p6 = pnand %p2147_p5, %p270_p1 }
  0x32   : > { %s276_s12 = sand.u32 (!%p271_p6), 1, %s2643_s28  }
  0x33   : > { %274 = sbr.rel (%p271_p6) target bundleno = 1051 (0x41b), region = 48  ;;  %s277_s10 = scalar_lea.sflag (!%p271_p6), [#allocation4], %s276_s12 }
  0x34   : > { %s2369_s18 = smul.u32 (!%p271_p6), 288, %s276_s12 }
  0x36   : > { %s280_s26 = scalar_lea.vmem (!%p271_p6), [#allocation3], %s2369_s18 }
  0x38   : > { %2618 = dma.done.wait (%p2797_p7), %s277_s10, 4608  }
  0x39   : > { %2620 = vsyncadd (%p2797_p7), %s277_s10, 4294962688  ;;  %s2295_s29 = sshll.u32 %s2651_s30, 7  ;;  %v2484_v0 = vld [vmem:[%s3765_s1 + $0x18] sm:$0xff]   ;;  %v2485_v1 = vld [vmem:[%s3765_s1 + $0x10] sm:$0xff]   ;;  %vm385_vm0 = vcmask 523264   ;;  %p549_p7 = scmp.gt.s32.totalorder %s2651_s30, 0 }
  0x3a   : > { %s2853_s19 = scalar_lea.vmem %s280_s26, %s2295_s29 [#allocation3]  ;;  %2321 = vmatprep.subr.bf16.mxu0 %v2484_v0  ;;  %v2486_v2 = vld [vmem:[%s3765_s1 + $0x8] sm:$0xff]   ;;  %v2487_v6 = vld [vmem:[%s3765_s1] sm:$0xff]   ;;  %vm681_vm2 = vcmask 1040384   ;;  %vm682_vm3 = vsmask.f32 256  ;;  %vm760_vm5 = vcmask 125952  }
  0x3b   : > { %2322 = vmatpush3.bf16.msra.mxu0 %v2484_v0  ;;  %v316_v3 = vld [vmem:[%s2853_s19] sm:$0xff]  ;;  %v317_v4 = vld [vmem:[%s2853_s19 + $0x8] sm:$0xff]  ;;  %v318_v7 = vld [vmem:[%s2853_s19 + $0x10] sm:$0xff]  ;;  %s550_s18 = scalar_select %p549_p7, 1, 0  ;;  %vm979_vm6 = vcmask 1046528  }
  0x3c   : > { %2323 = vmatprep.subr.bf16.mxu0 %v2485_v1  ;;  %v336_v5 = vpack.c.bf16 %v317_v4, %v316_v3  ;;  %v319_v8 = vld [vmem:[%s2853_s19 + $0x18] sm:$0xff]  ;;  %v320_v9 = vld [vmem:[%s2853_s19 + $0x20] sm:$0xff]  ;;  %v321_v10 = vld [vmem:[%s2853_s19 + $0x28] sm:$0xff]  ;;  %s2672_s10 = smov 48   ;;  %s2673_s26 = smov 80   ;;  %vm954_vm9 = vcmask 257152  }
  0x3d   : > { %v337_v11 = vpack.c.bf16 %v319_v8, %v318_v7  ;;  %v338_v12 = vpack.c.bf16 %v321_v10, %v320_v9  ;;  %v322_v13 = vld [vmem:[%s2853_s19 + $0x30] sm:$0xff]  ;;  %v323_v14 = vld [vmem:[%s2853_s19 + $0x38] sm:$0xff]  ;;  %v324_v15 = vld [vmem:[%s2853_s19 + $0x40] sm:$0xff]  ;;  %v551_v40 = vstv %s550_s18  ;;  %vm777_vm7 = vsmask.f32 7424  ;;  %s2674_s29 = smov 32  }
  0x3e   : > { %2329 = vmatprep.mubr.msk.bf16.mxu0 %vm385_vm0, %v336_v5  ;;  %v325_v16 = vld [vmem:[%s2853_s19 + $0x48] sm:$0xff]  ;;  %v339_v17 = vpack.c.bf16 %v323_v14, %v322_v13  ;;  %v326_v19 = vld [vmem:[%s2853_s19 + $0x50] sm:$0xff]  ;;  %v327_v20 = vld [vmem:[%s2853_s19 + $0x58] sm:$0xff]  ;;  %vm552_vm1 = vcmp.eq.s32.totalorder %v551_v40, 1  ;;  %s2675_s22 = smov 64   ;;  %s2676_s21 = smov 16  }
  0x3f   : > { %2324 = vmatpush3.bf16.msra.mxu0 %v2485_v1  ;;  %v340_v18 = vpack.c.bf16 %v325_v16, %v324_v15  ;;  %v328_v21 = vld [vmem:[%s2853_s19 + $0x60] sm:$0xff]  ;;  %v329_v22 = vld [vmem:[%s2853_s19 + $0x68] sm:$0xff]  ;;  %v341_v23 = vpack.c.bf16 %v327_v20, %v326_v19  ;;  %v330_v25 = vld [vmem:[%s2853_s19 + $0x70] sm:$0xff]  ;;  %s2677_s14 = smov 96   ;;  %p553_p4 = scmp.lt.s32.totalorder %s2651_s30, 1  ;;  %vm1084_vm10 = vcmask 388352  }
  0x40   : > { %2325 = vmatprep.subr.bf16.mxu0 %v2486_v2  ;;  %v342_v24 = vpack.c.bf16 %v329_v22, %v328_v21  ;;  %v331_v26 = vld [vmem:[%s2853_s19 + $0x78] sm:$0xff]  ;;  %v332_v27 = vld [vmem:[%s2853_s19 + $0x80] sm:$0xff]  ;;  %v333_v28 = vld [vmem:[%s2853_s19 + $0x88] sm:$0xff]  ;;  %s2679_s17 = smov 112   ;;  %vm1154_vm11 = vcmask 519552   ;;  %vm1235_vm12 = vcmask 650752  }
  0x41   : > { %v343_v29 = vpack.c.bf16 %v331_v26, %v330_v25  ;;  %v344_v30 = vpack.c.bf16 %v333_v28, %v332_v27  ;;  %v334_v31 = vld [vmem:[%s2853_s19 + $0x90] sm:$0xff]  ;;  %v335_v32 = vld [vmem:[%s2853_s19 + $0x98] sm:$0xff]  ;;  %v2895_v35 = vld [vmem:[%s3766_s2] ss:$0 sm:$0xff]  ;;  %s554_s16 = scalar_select %p553_p4, 1, 0 }
  0x42   : > { %v345_v33 = vpack.c.bf16 %v335_v32, %v334_v31  ;;  %vm2903_vm4 = vmand %vm681_vm2, %vm682_vm3  ;;  %v2492_v60 = vld [vmem:[%s3767_s3 + $0x18] sm:$0xff]   ;;  %vm1308_vm13 = vcmask 781952   ;;  %vm1378_vm14 = vcmask 913152   ;;  %vm1459_vm15 = vcmask 1044352   ;;  %s2297_s18 = sshll.u32 %s2651_s30, 4 }
  0x43   : > { %2326 = vmatpush3.bf16.msra.mxu0 %v2486_v2 }
  0x44   : > { %2327 = vmatprep.subr.bf16.mxu0 %v2487_v6 }
  0x47   : > { %2328 = vmatpush3.bf16.msra.mxu0 %v2487_v6 }
  0x4a   : > { %2330 = vmatmul.mubr.msk.bf16.vlgmr.msra.gmra.mxu0 %vm385_vm0, %v337_v11 }
  0x4b   : > { %2333 = vmatprep.mubr.msk.bf16.mxu0 %vm385_vm0, %v338_v12 }
  0x52   : > { %2334 = vmatmul.mubr.msk.bf16.gmra.mxu0 %vm385_vm0, %v339_v17 }
  0x53   : > { %2337 = vmatprep.mubr.msk.bf16.mxu0 %vm385_vm0, %v340_v18 }
  0x5a   : > { %2338 = vmatmul.mubr.msk.bf16.gmra.mxu0 %vm385_vm0, %v341_v23 }
  0x5b   : > { %2341 = vmatprep.mubr.msk.bf16.mxu0 %vm385_vm0, %v342_v24 }
  0x62   : > { %2342 = vmatmul.mubr.msk.bf16.gmra.mxu0 %vm385_vm0, %v343_v29 }
  0x63   : > { %2345 = vmatprep.mubr.msk.bf16.mxu0 %vm385_vm0, %v344_v30 }
  0x6a   : > { %2346 = vmatmul.mubr.msk.bf16.gmra.mxu0 %vm385_vm0, %v345_v33 }
 0x10a   : > { %v2331_v34 = vpop.f32.mrf.mxu0 }
 0x10b   : > { %v459_v37 = vadd.f32 %v2331_v34, %v2895_v35 }
 0x10c   : > { %v450_v36 = vpop.f32.mrf.mxu0 }
 0x10d   : > { %v451_v38 = vadd.f32 %v2895_v35, %v450_v36  ;;  %v531_v43 = vmax.f32 %v459_v37, 0.0 }
 0x10e   : > { %v2332_v39 = vpop.f32.mrf.mxu0 }
 0x10f   : > { %v462_v41 = vadd.f32 %v2332_v39, %v2895_v35  ;;  %v529_v44 = vmax.f32 %v451_v38, 0.0 }
 0x110   : > { %v453_v42 = vpop.f32.mrf.mxu0 }
 0x111   : > { %v532_v45 = vmax.f32 %v462_v41, 0.0  ;;  %v454_v46 = vadd.f32 %v2895_v35, %v453_v42  ;;  %v561_v52 = vsel %vm552_vm1, %v529_v44, 0.0 }
 0x112   : > { %v2335_v47 = vpop.f32.mrf.mxu0 }
 0x113   : > { %v582_v48 = vpack.c.bf16 %v532_v45, %v531_v43  ;;  %v530_v49 = vmax.f32 %v454_v46, 0.0  ;;  %v475_v50 = vadd.f32 %v2335_v47, %v2895_v35 }
 0x114   : > { %v466_v51 = vpop.f32.mrf.mxu0 }
 0x115   : > { %v599_v53 = vshrl.u32 %v582_v48, 16  ;;  %v562_v54 = vsel %vm552_vm1, %v530_v49, 0.0  ;;  %v467_v56 = vadd.f32 %v2895_v35, %v466_v51  ;;  %v602_v59 = vshll.u32 %v582_v48, 16 }
 0x116   : > { %v581_v55 = vpack.c.bf16 %v562_v54, %v561_v52  ;;  %v2336_v57 = vpop.f32.mrf.mxu0  ;;  %v535_v61 = vmax.f32 %v475_v50, 0.0  ;;  %vm1683_vm1 = vcmask 130048  }
 0x117   : > { %v601_v58 = vrot.slane %v599_v53, 7  ;;  %v478_v62 = vadd.f32 %v2336_v57, %v2895_v35  ;;  %v533_v2 = vmax.f32 %v467_v56, 0.0 }
 0x118   : > { %v592_v63 = vshrl.u32 %v581_v55, 16  ;;  %v469_v0 = vpop.f32.mrf.mxu0  ;;  %v595_v7 = vshll.u32 %v581_v55, 16 }
 0x119   : > { %v604_v1 = vor.u32 %v602_v59, %v601_v58  ;;  %v536_v3 = vmax.f32 %v478_v62, 0.0  ;;  %v470_v4 = vadd.f32 %v2895_v35, %v469_v0  ;;  %v695_v5 = vsel %vm2903_vm4, %v601_v58, 0 }
 0x11a   : > { %v594_v6 = vrot.slane %v592_v63, 7  ;;  %v2339_v8 = vpop.f32.mrf.mxu0  ;;  %v984_v15 = vrot.slane %v695_v5, 1  ;;  %v798_v30 = vshll.u32 %v695_v5, 16 }
 0x11b   : > { %v584_v9 = vpack.c.bf16 %v536_v3, %v535_v61  ;;  %v534_v10 = vmax.f32 %v470_v4, 0.0  ;;  %v685_v11 = vsel %vm2903_vm4, 0, %v604_v1  ;;  %v491_v41 = vadd.f32 %v2339_v8, %v2895_v35 }
 0x11c   : > { %v597_v12 = vor.u32 %v595_v7, %v594_v6  ;;  %v2169_v13 = vcombine.high %v685_v11, %v685_v11  ;;  %v482_v14 = vpop.f32.mrf.mxu0  ;;  %v2919_v20 = vsel %vm2903_vm4, %v594_v6, 0  ;;  %v2168_v21 = vcombine.low %v685_v11, %v685_v11 }
 0x11d   : > { %v613_v16 = vshrl.u32 %v584_v9, 16  ;;  %v616_v17 = vshll.u32 %v584_v9, 16  ;;  %v583_v18 = vpack.c.bf16 %v534_v10, %v533_v2  ;;  %v983_v22 = vrot.slane %v685_v11, 1 }
 0x11e   : > { %v2915_v19 = vsel %vm2903_vm4, 0, %v597_v12  ;;  %1108 = vrot.lane.b32.xlu1 %v2169_v13, %s2672_s10  ;;  %764 = vst.msk [vmem:[#allocation2 + $0x18] sm:$0xf] %vm760_vm5, %v2169_v13  ;;  %v793_v26 = vshll.u32 %v685_v11, 16  ;;  %v2340_v27 = vpop.f32.mrf.mxu0  ;;  %1106 = vrot.lane.b32.xlu0 %v2168_v21, %s2672_s10  ;;  %763 = vst.msk [vmem:[#allocation2 + $0x10] sm:$0xf] %vm760_vm5, %v2168_v21  ;;  %v483_v61 = vadd.f32 %v2895_v35, %v482_v14 }
 0x11f   : > { %v615_v23 = vrot.slane %v613_v16, 7  ;;  %v606_v24 = vshrl.u32 %v583_v18, 16  ;;  %v609_v25 = vshll.u32 %v583_v18, 16  ;;  %v985_v28 = vsel %vm979_vm6, %v983_v22, %v984_v15 }
 0x120   : > { %v980_v29 = vrot.slane %v2915_v19, 1  ;;  %v2201_v33 = vcombine.high %v985_v28, %v985_v28  ;;  %v2200_v34 = vcombine.low %v985_v28, %v985_v28  ;;  %v791_v36 = vshrl.u32 %v685_v11, 16  ;;  %v485_v42 = vpop.f32.mrf.mxu0 }
 0x121   : > { %v618_v31 = vor.u32 %v616_v17, %v615_v23  ;;  %v608_v32 = vrot.slane %v606_v24, 7  ;;  %v795_v37 = vrot.slane %v793_v26, 1  ;;  %v981_v38 = vrot.slane %v2919_v20, 1 }
 0x122   : > { %v2930_v39 = vsel %vm2903_vm4, %v615_v23, 0  ;;  %1262 = vrot.lane.b32.xlu1 %v2201_v33, %s2673_s26  ;;  %1260 = vrot.lane.b32.xlu0 %v2200_v34, %s2673_s26  ;;  %v800_v47 = vrot.slane %v798_v30, 1  ;;  %v2343_v49 = vpop.f32.mrf.mxu0  ;;  %v781_v57 = vshll.u32 %v2915_v19, 16  ;;  %v539_v59 = vmax.f32 %v491_v41, 0.0 }
 0x123   : > { %v611_v40 = vor.u32 %v609_v25, %v608_v32  ;;  %v2936_v43 = vsel %vm2903_vm4, 0, %v618_v31  ;;  %v2940_v44 = vsel %vm2903_vm4, %v608_v32, 0  ;;  %v796_v45 = vor.u32 %v795_v37, %v791_v36 }
 0x124   : > { %v982_v46 = vsel %vm979_vm6, %v980_v29, %v981_v38  ;;  %v2946_v48 = vcombine.low %v2936_v43, %v2936_v43  ;;  %v990_v50 = vrot.slane %v2930_v39, 1  ;;  %v2955_v52 = vcombine.high %v2936_v43, %v2936_v43  ;;  %v498_v2 = vpop.f32.mrf.mxu0 }
 0x125   : > { %v2951_v51 = vsel %vm2903_vm4, 0, %v611_v40  ;;  %v987_v53 = vrot.slane %v2940_v44, 1  ;;  %v801_v54 = vsel %vm777_vm7, %v796_v45, %v800_v47  ;;  %v2198_v55 = vcombine.low %v982_v46, %v982_v46 }
 0x126   : > { %1042 = vrot.lane.b32.xlu1 %v2201_v33, %s2674_s29  ;;  %767 = vst.msk [vmem:[#allocation2 + $0x30] sm:$0xf] %vm760_vm5, %v2946_v48  ;;  %v2964_v56 = vcombine.high %v2951_v51, %v2951_v51  ;;  %1040 = vrot.lane.b32.xlu0 %v2200_v34, %s2674_s29  ;;  %768 = vst.msk [vmem:[#allocation2 + $0x38] sm:$0xf] %vm760_vm5, %v2955_v52  ;;  %v2972_v58 = vcombine.low %v2951_v51, %v2951_v51  ;;  %v989_v62 = vrot.slane %v2936_v43, 1  ;;  %v2344_v16 = vpop.f32.mrf.mxu0 }
 0x127   : > { %v494_v63 = vadd.f32 %v2340_v27, %v2895_v35  ;;  %v486_v0 = vadd.f32 %v2895_v35, %v485_v42  ;;  %v986_v1 = vrot.slane %v2951_v51, 1  ;;  %v2184_v3 = vcombine.low %v801_v54, %v801_v54 }
 0x128   : > { %766 = vst.msk [vmem:[#allocation2 + $0x28] sm:$0xf] %vm760_vm5, %v2964_v56  ;;  %765 = vst.msk [vmem:[#allocation2 + $0x20] sm:$0xf] %vm760_vm5, %v2972_v58  ;;  %v537_v4 = vmax.f32 %v483_v61, 0.0  ;;  %v991_v5 = vsel %vm979_vm6, %v989_v62, %v990_v50  ;;  %v783_v9 = vrot.slane %v781_v57, 1  ;;  %v2199_v13 = vcombine.high %v982_v46, %v982_v46  ;;  %v501_v31 = vpop.f32.mrf.mxu0 }
 0x129   : > { %v540_v6 = vmax.f32 %v494_v63, 0.0  ;;  %v538_v7 = vmax.f32 %v486_v0, 0.0  ;;  %v988_v8 = vsel %vm979_vm6, %v986_v1, %v987_v53  ;;  %v2987_v10 = vcombine.high %v991_v5, %v991_v5 }
 0x12a   : > { %1036 = vrot.lane.b32.xlu1 %v2198_v55, %s2674_s29  ;;  %1187 = vrot.lane.b32.xlu0 %v2184_v3, %s2675_s22  ;;  %v2989_v11 = vcombine.low %v991_v5, %v991_v5  ;;  %v2991_v12 = vcombine.high %v988_v8, %v988_v8  ;;  %v786_v17 = vshll.u32 %v2919_v20, 16  ;;  %v779_v18 = vshrl.u32 %v2915_v19, 16 }
 0x12b   : > { %v586_v14 = vpack.c.bf16 %v540_v6, %v539_v59  ;;  %v585_v15 = vpack.c.bf16 %v538_v7, %v537_v4  ;;  %1503 = vst.msk [vmem:[#allocation2 + $0x1c] sm:$0xf] %vm760_vm5, %v2987_v10  ;;  %v3001_v21 = vcombine.low %v988_v8, %v988_v8  ;;  %v2185_v20 = vcombine.high %v801_v54, %v801_v54 }
 0x12c   : > { %1502 = vst.msk [vmem:[#allocation2 + $0x14] sm:$0xf] %vm760_vm5, %v2989_v11  ;;  %1501 = vst.msk [vmem:[#allocation2 + $0xc] sm:$0xf] %vm760_vm5, %v2991_v12  ;;  %v784_v26 = vor.u32 %v783_v9, %v779_v18  ;;  %v507_v29 = vadd.f32 %v2343_v49, %v2895_v35  ;;  %v499_v30 = vadd.f32 %v2895_v35, %v498_v2  ;;  %v788_v32 = vrot.slane %v786_v17, 1 }
 0x12d   : > { %v627_v22 = vshrl.u32 %v586_v14, 16  ;;  %v630_v23 = vshll.u32 %v586_v14, 16  ;;  %v620_v24 = vshrl.u32 %v585_v15, 16  ;;  %v623_v25 = vshll.u32 %v585_v15, 16  ;;  %1500 = vst.msk [vmem:[#allocation2 + $0x4] sm:$0xf] %vm760_vm5, %v3001_v21 }
 0x12e   : > { %1038 = vrot.lane.b32.xlu1 %v2199_v13, %s2674_s29  ;;  %910 = vrot.lane.b32.xlu0 %v2184_v3, %s2676_s21  ;;  %v789_v37 = vsel %vm777_vm7, %v784_v26, %v788_v32  ;;  %v510_v40 = vadd.f32 %v2344_v16, %v2895_v35  ;;  %v502_v41 = vadd.f32 %v2895_v35, %v501_v31  ;;  %v543_v46 = vmax.f32 %v507_v29, 0.0 }
 0x12f   : > { %v629_v27 = vrot.slane %v627_v22, 7  ;;  %v622_v28 = vrot.slane %v620_v24, 7  ;;  %v541_v47 = vmax.f32 %v499_v30, 0.0  ;;  %v2182_v62 = vcombine.low %v789_v37, %v789_v37 }
 0x130   : > { %v544_v63 = vmax.f32 %v510_v40, 0.0  ;;  %v542_v0 = vmax.f32 %v502_v41, 0.0  ;;  %v2183_v8 = vcombine.high %v789_v37, %v789_v37  ;;  %v2166_v31 = vcombine.low %v2915_v19, %v2915_v19 }
 0x131   : > { %v632_v33 = vor.u32 %v630_v23, %v629_v27  ;;  %v699_v34 = vsel %vm2903_vm4, %v629_v27, 0  ;;  %v625_v36 = vor.u32 %v623_v25, %v622_v28  ;;  %v3017_v38 = vsel %vm2903_vm4, %v622_v28, 0 }
 0x132   : > { %1189 = vrot.lane.b32.xlu1 %v2185_v20, %s2675_s22  ;;  %1334 = vrot.lane.b32.xlu0 %v2946_v48, %s2677_s14  ;;  %v996_v45 = vrot.slane %v699_v34, 1  ;;  %v846_v49 = vshll.u32 %v699_v34, 16  ;;  %v993_v55 = vrot.slane %v3017_v38, 1  ;;  %v588_v6 = vpack.c.bf16 %v544_v63, %v543_v46  ;;  %761 = vst.msk [vmem:[#allocation2] sm:$0xf] %vm760_vm5, %v2166_v31 }
 0x133   : > { %v689_v42 = vsel %vm2903_vm4, 0, %v632_v33  ;;  %v3025_v50 = vsel %vm2903_vm4, 0, %v625_v36  ;;  %v587_v7 = vpack.c.bf16 %v542_v0, %v541_v47  ;;  %v2167_v32 = vcombine.high %v2915_v19, %v2915_v19 }
 0x134   : > { %v3027_v53 = vcombine.high %v689_v42, %v689_v42  ;;  %v3029_v54 = vcombine.low %v689_v42, %v689_v42  ;;  %v3035_v57 = vcombine.high %v3025_v50, %v3025_v50  ;;  %v3039_v59 = vcombine.low %v3025_v50, %v3025_v50 }
 0x135   : > { %v995_v61 = vrot.slane %v689_v42, 1  ;;  %v992_v2 = vrot.slane %v3025_v50, 1  ;;  %v841_v3 = vshll.u32 %v689_v42, 16  ;;  %v848_v9 = vrot.slane %v846_v49, 1  ;;  %762 = vst.msk [vmem:[#allocation2 + $0x8] sm:$0xf] %vm760_vm5, %v2167_v32 }
 0x136   : > { %912 = vrot.lane.b32.xlu1 %v2185_v20, %s2676_s21  ;;  %1114 = vrot.lane.b32.xlu0 %v2946_v48, %s2672_s10  ;;  %772 = vst.msk [vmem:[#allocation2 + $0x58] sm:$0xf] %vm760_vm5, %v3027_v53  ;;  %771 = vst.msk [vmem:[#allocation2 + $0x50] sm:$0xf] %vm760_vm5, %v3029_v54  ;;  %v839_v48 = vshrl.u32 %v689_v42, 16  ;;  %v641_v15 = vshrl.u32 %v588_v6, 16 }
 0x137   : > { %770 = vst.msk [vmem:[#allocation2 + $0x48] sm:$0xf] %vm760_vm5, %v3035_v57  ;;  %769 = vst.msk [vmem:[#allocation2 + $0x40] sm:$0xf] %vm760_vm5, %v3039_v59  ;;  %v997_v1 = vsel %vm979_vm6, %v995_v61, %v996_v45  ;;  %v994_v13 = vsel %vm979_vm6, %v992_v2, %v993_v55  ;;  %v843_v14 = vrot.slane %v841_v3, 1  ;;  %v644_v16 = vshll.u32 %v588_v6, 16 }
 0x138   : > { %v3053_v4 = vcombine.high %v997_v1, %v997_v1  ;;  %v3055_v5 = vcombine.low %v997_v1, %v997_v1  ;;  %v634_v17 = vshrl.u32 %v587_v7, 16  ;;  %v637_v18 = vshll.u32 %v587_v7, 16 }
 0x139   : > { %v3065_v22 = vcombine.high %v994_v13, %v994_v13  ;;  %v3067_v23 = vcombine.low %v994_v13, %v994_v13  ;;  %v844_v24 = vor.u32 %v843_v14, %v839_v48  ;;  %v829_v25 = vshll.u32 %v3025_v50, 16 }
 0x13a   : > { %1336 = vrot.lane.b32.xlu1 %v2955_v52, %s2677_s14  ;;  %906 = vrot.lane.b32.xlu0 %v2182_v62, %s2676_s21  ;;  %1507 = vst.msk [vmem:[#allocation2 + $0x3c] sm:$0xf] %vm760_vm5, %v3053_v4  ;;  %1506 = vst.msk [vmem:[#allocation2 + $0x34] sm:$0xf] %vm760_vm5, %v3055_v5  ;;  %v834_v20 = vshll.u32 %v3017_v38, 16  ;;  %v643_v26 = vrot.slane %v641_v15, 7 }
 0x13b   : > { %v636_v27 = vrot.slane %v634_v17, 7  ;;  %v827_v28 = vshrl.u32 %v3025_v50, 16  ;;  %1505 = vst.msk [vmem:[#allocation2 + $0x2c] sm:$0xf] %vm760_vm5, %v3065_v22  ;;  %1504 = vst.msk [vmem:[#allocation2 + $0x24] sm:$0xf] %vm760_vm5, %v3067_v23  ;;  %v3079_v29 = vsel %vm777_vm7, %v844_v24, %v848_v9  ;;  %v2347_v50 = vpop.f32.mrf.mxu0  ;;  %v555_v17 = vstv %s554_s16 }
 0x13c   : > { %v831_v30 = vrot.slane %v829_v25, 1  ;;  %v646_v33 = vor.u32 %v644_v16, %v643_v26  ;;  %v836_v37 = vrot.slane %v834_v20, 1  ;;  %v817_v55 = vshll.u32 %v2936_v43, 16  ;;  %s2291_s16 = sshll.u32 %s2655_s8, 5 }
 0x13d   : > { %v639_v34 = vor.u32 %v637_v18, %v636_v27  ;;  %v3090_v36 = vsel %vm2903_vm4, %v636_v27, 0  ;;  %v523_v1 = vadd.f32 %v2347_v50, %v2895_v35  ;;  %v514_v2 = vpop.f32.mrf.mxu0  ;;  %vm3157_vm8 = vcmp.eq.s32.totalorder %v555_v17, 1  ;;  %s2046_s20 = sadd.s32 %s2297_s18, %s2291_s16 }
 0x13e   : > { %1116 = vrot.lane.b32.xlu1 %v2955_v52, %s2672_s10  ;;  %908 = vrot.lane.b32.xlu0 %v2183_v8, %s2676_s21  ;;  %v701_v52 = vsel %vm2903_vm4, %v643_v26, 0  ;;  %v691_v19 = vsel %vm2903_vm4, 0, %v646_v33  ;;  %v999_v41 = vrot.slane %v3090_v36, 1  ;;  %v832_v46 = vor.u32 %v831_v30, %v827_v28  ;;  %v2488_v26 = vld [vmem:[%s3767_s3 + $0x38] sm:$0xff]   ;;  %s2292_s30 = sshll.u32 %s2046_s20, 7 }
 0x13f   : > { %v1002_v38 = vrot.slane %v701_v52, 1  ;;  %v3100_v40 = vsel %vm2903_vm4, 0, %v639_v34  ;;  %v3103_v42 = vcombine.high %v691_v19, %v691_v19  ;;  %v3105_v45 = vcombine.low %v691_v19, %v691_v19  ;;  %v2348_v16 = vpop.f32.mrf.mxu0 }
 0x140   : > { %v3111_v47 = vcombine.high %v3100_v40, %v3100_v40  ;;  %v3115_v49 = vcombine.low %v3100_v40, %v3100_v40  ;;  %v1001_v61 = vrot.slane %v691_v19, 1  ;;  %v998_v62 = vrot.slane %v3100_v40, 1 }
 0x141   : > { %776 = vst.msk [vmem:[#allocation2 + $0x78] sm:$0xf] %vm760_vm5, %v3103_v42  ;;  %775 = vst.msk [vmem:[#allocation2 + $0x70] sm:$0xf] %vm760_vm5, %v3105_v45  ;;  %v870_v63 = vshll.u32 %v701_v52, 16  ;;  %v3125_v0 = vsel %vm777_vm7, %v832_v46, %v836_v37  ;;  %v865_v48 = vshll.u32 %v691_v19, 16  ;;  %v515_v18 = vadd.f32 %v2895_v35, %v514_v2  ;;  %v517_v20 = vpop.f32.mrf.mxu0 }
 0x142   : > { %1332 = vrot.lane.b32.xlu1 %v2964_v56, %s2677_s14  ;;  %1330 = vrot.lane.b32.xlu0 %v2972_v58, %s2677_s14  ;;  %774 = vst.msk [vmem:[#allocation2 + $0x68] sm:$0xf] %vm760_vm5, %v3111_v47  ;;  %773 = vst.msk [vmem:[#allocation2 + $0x60] sm:$0xf] %vm760_vm5, %v3115_v49  ;;  %v858_v3 = vshll.u32 %v3090_v36, 16  ;;  %v1003_v6 = vsel %vm979_vm6, %v1001_v61, %v1002_v38  ;;  %v1000_v7 = vsel %vm979_vm6, %v998_v62, %v999_v41  ;;  %v2678_v32 = vmov 0  }
 0x143   : > { %v863_v8 = vshrl.u32 %v691_v19, 16  ;;  %v3139_v9 = vcombine.high %v1003_v6, %v1003_v6  ;;  %v3141_v13 = vcombine.low %v1003_v6, %v1003_v6  ;;  %v3143_v14 = vcombine.high %v1000_v7, %v1000_v7  ;;  %1708 = vmatprep.subr.bf16.mxu1 %v2678_v32  ;;  %v2489_v61 = vld [vmem:[%s3767_s3 + $0x30] sm:$0xff]  }
 0x144   : > { %v3145_v15 = vcombine.low %v1000_v7, %v1000_v7  ;;  %v526_v24 = vadd.f32 %v2348_v16, %v2895_v35  ;;  %v872_v25 = vrot.slane %v870_v63, 1  ;;  %v867_v27 = vrot.slane %v865_v48, 1  ;;  %1709 = vmatpush1.bf16.msra.mxu1 %v2488_v26  ;;  %v2490_v7 = vld [vmem:[%s3767_s3 + $0x28] sm:$0xff]   ;;  %v2491_v26 = vld [vmem:[%s3767_s3 + $0x20] sm:$0xff]  }
 0x145   : > { %1511 = vst.msk [vmem:[#allocation2 + $0x5c] sm:$0xf] %vm760_vm5, %v3139_v9  ;;  %1510 = vst.msk [vmem:[#allocation2 + $0x54] sm:$0xf] %vm760_vm5, %v3141_v13  ;;  %v545_v30 = vmax.f32 %v515_v18, 0.0  ;;  %v518_v33 = vadd.f32 %v2895_v35, %v517_v20  ;;  %v822_v52 = vshll.u32 %v2930_v39, 16  ;;  %1710 = vmatprep.subr.bf16.mxu1 %v2678_v32 }
 0x146   : > { %1112 = vrot.lane.b32.xlu1 %v2964_v56, %s2672_s10  ;;  %1110 = vrot.lane.b32.xlu0 %v2972_v58, %s2672_s10  ;;  %v547_v56 = vmax.f32 %v523_v1, 0.0  ;;  %1509 = vst.msk [vmem:[#allocation2 + $0x4c] sm:$0xf] %vm760_vm5, %v3143_v14  ;;  %1508 = vst.msk [vmem:[#allocation2 + $0x44] sm:$0xf] %vm760_vm5, %v3145_v15  ;;  %v548_v31 = vmax.f32 %v526_v24, 0.0  ;;  %v868_v34 = vor.u32 %v867_v27, %v863_v8 }
 0x147   : > { %v851_v36 = vshrl.u32 %v3100_v40, 16  ;;  %v853_v37 = vshll.u32 %v3100_v40, 16  ;;  %v815_v19 = vshrl.u32 %v2936_v43, 16  ;;  %v819_v38 = vrot.slane %v817_v55, 1 }
 0x148   : > { %v579_v28 = vsel %vm3157_vm8, %v547_v56, 0.0  ;;  %v580_v41 = vsel %vm3157_vm8, %v548_v31, 0.0  ;;  %v546_v46 = vmax.f32 %v518_v33, 0.0  ;;  %v860_v35 = vrot.slane %v858_v3, 1  ;;  %1711 = vmatpush1.bf16.msra.mxu1 %v2489_v61  ;;  %v2496_v61 = vld [vmem:[%s3767_s3 + $0x40] sm:$0xff]  }
 0x149   : > { %v590_v39 = vpack.c.bf16 %v580_v41, %v579_v28  ;;  %v3180_v50 = vsel %vm777_vm7, %v868_v34, %v872_v25  ;;  %v855_v62 = vrot.slane %v853_v37, 1  ;;  %1712 = vmatprep.subr.bf16.mxu1 %v2678_v32  ;;  %v824_v48 = vrot.slane %v822_v52, 1  ;;  %v2494_v37 = vld [vmem:[%s3767_s3 + $0x8] sm:$0xff]  }
 0x14a   : > { %1270 = vrot.lane.b32.xlu1 %v2987_v10, %s2673_s26  ;;  %1268 = vrot.lane.b32.xlu0 %v2989_v11, %s2673_s26  ;;  %v589_v43 = vpack.c.bf16 %v546_v46, %v545_v30  ;;  %v820_v3 = vor.u32 %v819_v38, %v815_v19  ;;  %v810_v52 = vshll.u32 %v2940_v44, 16  ;;  %v803_v34 = vshrl.u32 %v2951_v51, 16 }
 0x14b   : > { %v655_v40 = vshrl.u32 %v590_v39, 16  ;;  %v658_v55 = vshll.u32 %v590_v39, 16  ;;  %v856_v63 = vor.u32 %v855_v62, %v851_v36 }
 0x14c   : > { %v648_v1 = vshrl.u32 %v589_v43, 16  ;;  %v651_v2 = vshll.u32 %v589_v43, 16  ;;  %1713 = vmatpush1.bf16.msra.mxu1 %v2490_v7  ;;  %v825_v24 = vsel %vm777_vm7, %v820_v3, %v824_v48  ;;  %v812_v19 = vrot.slane %v810_v52, 1 }
 0x14d   : > { %v657_v6 = vrot.slane %v655_v40, 7  ;;  %1714 = vmatprep.subr.bf16.mxu1 %v2678_v32  ;;  %v2189_v27 = vcombine.high %v825_v24, %v825_v24  ;;  %v2188_v30 = vcombine.low %v825_v24, %v825_v24 }
 0x14e   : > { %1050 = vrot.lane.b32.xlu1 %v2987_v10, %s2674_s29  ;;  %1048 = vrot.lane.b32.xlu0 %v2989_v11, %s2674_s29  ;;  %v3194_v10 = vsel %vm777_vm7, %v856_v63, %v860_v35  ;;  %v650_v11 = vrot.slane %v648_v1, 7 }
 0x14f   : > { %v660_v8 = vor.u32 %v658_v55, %v657_v6  ;;  %v3202_v16 = vsel %vm2903_vm4, %v657_v6, 0 }
 0x150   : > { %v1478_v56 = vrot.slane %v3202_v16, 1  ;;  %v653_v17 = vor.u32 %v651_v2, %v650_v11  ;;  %v702_v18 = vsel %vm2903_vm4, %v650_v11, 0  ;;  %1715 = vmatpush1.bf16.msra.mxu1 %v2491_v26  ;;  %v1403_v2 = vshll.u32 %v3202_v16, 16 }
 0x151   : > { %v3211_v25 = vsel %vm2903_vm4, 0, %v660_v8  ;;  %1716 = vmatprep.subr.bf16.mxu1 %v2678_v32  ;;  %v1179_v35 = vshll.u32 %v702_v18, 16  ;;  %v1254_v39 = vrot.slane %v702_v18, 1 }
 0x152   : > { %1266 = vrot.lane.b32.xlu1 %v2991_v12, %s2673_s26  ;;  %1264 = vrot.lane.b32.xlu0 %v3001_v21, %s2673_s26  ;;  %v1477_v58 = vrot.slane %v3211_v25, 1  ;;  %v3218_v20 = vsel %vm2903_vm4, 0, %v653_v17  ;;  %v1398_v3 = vshll.u32 %v3211_v25, 16  ;;  %v1405_v6 = vrot.slane %v1403_v2, 1 }
 0x153   : > { %v1174_v62 = vshll.u32 %v3218_v20, 16  ;;  %v1172_v55 = vshrl.u32 %v3218_v20, 16  ;;  %v1396_v7 = vshrl.u32 %v3211_v25, 16 }
 0x154   : > { %v1479_v28 = vsel %vm979_vm6, %v1477_v58, %v1478_v56  ;;  %1717 = vmatpush1.bf16.msra.mxu1 %v2492_v60  ;;  %v1400_v11 = vrot.slane %v1398_v3, 1  ;;  %v2215_v3 = vcombine.high %v3218_v20, %v3218_v20 }
 0x155   : > { %v2224_v31 = vcombine.low %v1479_v28, %v1479_v28  ;;  %v2225_v33 = vcombine.high %v1479_v28, %v1479_v28  ;;  %1718 = vmatprep.subr.bf16.mxu1 %v2678_v32  ;;  %v1176_v63 = vrot.slane %v1174_v62, 1 }
 0x156   : > { %1046 = vrot.lane.b32.xlu1 %v2991_v12, %s2674_s29  ;;  %1044 = vrot.lane.b32.xlu0 %v3001_v21, %s2674_s29  ;;  %v805_v12 = vshll.u32 %v2951_v51, 16  ;;  %v2493_v21 = vld [vmem:[%s3767_s3 + $0x10] sm:$0xff]   ;;  %v2495_v51 = vld [vmem:[%s3767_s3] sm:$0xff]   ;;  %v1401_v8 = vor.u32 %v1400_v11, %v1396_v7  ;;  %v2214_v7 = vcombine.low %v3218_v20, %v3218_v20 }
 0x157   : > { %1514 = vst.msk [vmem:[#allocation2 + $0x74] sm:$0xf] %vm760_vm5, %v2224_v31  ;;  %1515 = vst.msk [vmem:[#allocation2 + $0x7c] sm:$0xf] %vm760_vm5, %v2225_v33  ;;  %v1177_v1 = vor.u32 %v1176_v63, %v1172_v55  ;;  %v2221_v55 = vcombine.high %v3211_v25, %v3211_v25 }
 0x158   : > { %v807_v36 = vrot.slane %v805_v12, 1  ;;  %1719 = vmatpush1.bf16.msra.mxu1 %v2493_v21  ;;  %v3295_v16 = vsel %vm777_vm7, %v1401_v8, %v1405_v6  ;;  %v2499_v8 = vld [vmem:[#allocation2 + $0x4] ss:$8 sps:$4 sm:$0xff]  }
 0x159   : > { %1720 = vmatprep.subr.bf16.mxu1 %v2678_v32  ;;  %2252 = vmatprep.mubr.msk.bf16.mxu1 %vm1683_vm1, %v2499_v8 }
 0x15a   : > { %1417 = vrot.lane.b32.xlu1 %v2189_v27, %s2679_s17  ;;  %1415 = vrot.lane.b32.xlu0 %v2188_v30, %s2679_s17  ;;  %v808_v38 = vor.u32 %v807_v36, %v803_v34 }
 0x15c   : > { %1721 = vmatpush1.bf16.msra.mxu1 %v2494_v37  ;;  %v813_v44 = vsel %vm777_vm7, %v808_v38, %v812_v19 }
 0x15d   : > { %1722 = vmatprep.subr.bf16.mxu1 %v2678_v32  ;;  %v2187_v41 = vcombine.high %v813_v44, %v813_v44  ;;  %v2186_v46 = vcombine.low %v813_v44, %v813_v44 }
 0x15e   : > { %1197 = vrot.lane.b32.xlu1 %v2189_v27, %s2675_s22  ;;  %1195 = vrot.lane.b32.xlu0 %v2188_v30, %s2675_s22 }
 0x160   : > { %1723 = vmatpush1.bf16.msra.mxu1 %v2495_v51  ;;  %v2196_v51 = vcombine.low %v3180_v50, %v3180_v50 }
 0x161   : > { %1738 = vmatprep.subr.bf16.mxu1 %v2678_v32 }
 0x162   : > { %920 = vrot.lane.b32.xlu1 %v2189_v27, %s2676_s21  ;;  %918 = vrot.lane.b32.xlu0 %v2188_v30, %s2676_s21  ;;  %v2191_v27 = vcombine.high %v3125_v0, %v3125_v0  ;;  %v2190_v30 = vcombine.low %v3125_v0, %v3125_v0 }
 0x164   : > { %1739 = vmatpush2.bf16.msra.mxu1 %v2496_v61  ;;  %v2194_v61 = vcombine.low %v3194_v10, %v3194_v10 }
 0x166   : > { %1344 = vrot.lane.b32.xlu1 %v3027_v53, %s2677_s14  ;;  %1342 = vrot.lane.b32.xlu0 %v3029_v54, %s2677_s14 }
 0x16a   : > { %1124 = vrot.lane.b32.xlu1 %v3027_v53, %s2672_s10  ;;  %1122 = vrot.lane.b32.xlu0 %v3029_v54, %s2672_s10  ;;  %v1253_v53 = vrot.slane %v3218_v20, 1  ;;  %v1181_v54 = vrot.slane %v1179_v35, 1 }
 0x16c   : > { %v1255_v43 = vsel %vm979_vm6, %v1253_v53, %v1254_v39  ;;  %v3285_v48 = vsel %vm777_vm7, %v1177_v1, %v1181_v54  ;;  %v2220_v1 = vcombine.low %v3211_v25, %v3211_v25 }
 0x16d   : > { %v3272_v32 = vcombine.high %v1255_v43, %v1255_v43  ;;  %v3274_v40 = vcombine.low %v1255_v43, %v1255_v43 }
 0x16e   : > { %1413 = vrot.lane.b32.xlu1 %v2187_v41, %s2679_s17  ;;  %1411 = vrot.lane.b32.xlu0 %v2186_v46, %s2679_s17 }
 0x16f   : > { %1513 = vst.msk [vmem:[#allocation2 + $0x6c] sm:$0xf] %vm760_vm5, %v3272_v32  ;;  %1512 = vst.msk [vmem:[#allocation2 + $0x64] sm:$0xf] %vm760_vm5, %v3274_v40 }
 0x172   : > { %1193 = vrot.lane.b32.xlu1 %v2187_v41, %s2675_s22  ;;  %1191 = vrot.lane.b32.xlu0 %v2186_v46, %s2675_s22 }
 0x176   : > { %916 = vrot.lane.b32.xlu1 %v2187_v41, %s2676_s21  ;;  %914 = vrot.lane.b32.xlu0 %v2186_v46, %s2676_s21 }
 0x17a   : > { %1340 = vrot.lane.b32.xlu1 %v3035_v57, %s2677_s14  ;;  %1338 = vrot.lane.b32.xlu0 %v3039_v59, %s2677_s14 }
 0x17e   : > { %1120 = vrot.lane.b32.xlu1 %v3035_v57, %s2672_s10  ;;  %1118 = vrot.lane.b32.xlu0 %v3039_v59, %s2672_s10  ;;  %v2193_v59 = vcombine.high %v3079_v29, %v3079_v29 }
 0x182   : > { %1278 = vrot.lane.b32.xlu1 %v3053_v4, %s2673_s26  ;;  %1276 = vrot.lane.b32.xlu0 %v3055_v5, %s2673_s26 }
 0x186   : > { %1058 = vrot.lane.b32.xlu1 %v3053_v4, %s2674_s29  ;;  %1056 = vrot.lane.b32.xlu0 %v3055_v5, %s2674_s29  ;;  %v2192_v5 = vcombine.low %v3079_v29, %v3079_v29 }
 0x18a   : > { %1274 = vrot.lane.b32.xlu1 %v3065_v22, %s2673_s26  ;;  %1272 = vrot.lane.b32.xlu0 %v3067_v23, %s2673_s26 }
 0x18e   : > { %1054 = vrot.lane.b32.xlu1 %v3065_v22, %s2674_s29  ;;  %1052 = vrot.lane.b32.xlu0 %v3067_v23, %s2674_s29 }
 0x190   : > { %v1109_v57 = vpop.permute.xlu1 %1108  ;;  %v1107_v4 = vpop.permute.xlu0 %1106 }
 0x192   : > { %1425 = vrot.lane.b32.xlu1 %v2193_v59, %s2679_s17  ;;  %1423 = vrot.lane.b32.xlu0 %v2192_v5, %s2679_s17 }
 0x194   : > { %v1263_v56 = vpop.permute.xlu1 %1262  ;;  %v1261_v17 = vpop.permute.xlu0 %1260 }
 0x196   : > { %1205 = vrot.lane.b32.xlu1 %v2193_v59, %s2675_s22  ;;  %1203 = vrot.lane.b32.xlu0 %v2192_v5, %s2675_s22 }
 0x198   : > { %v1043_v22 = vpop.permute.xlu1 %1042  ;;  %v1041_v23 = vpop.permute.xlu0 %1040 }
 0x19a   : > { %928 = vrot.lane.b32.xlu1 %v2193_v59, %s2676_s21  ;;  %926 = vrot.lane.b32.xlu0 %v2192_v5, %s2676_s21  ;;  %v2217_v5 = vcombine.high %v3285_v48, %v3285_v48 }
 0x19c   : > { %v1037_v18 = vpop.permute.xlu1 %1036  ;;  %v1188_v24 = vpop.permute.xlu0 %1187 }
 0x19e   : > { %1352 = vrot.lane.b32.xlu1 %v3103_v42, %s2677_s14  ;;  %1350 = vrot.lane.b32.xlu0 %v3105_v45, %s2677_s14 }
 0x1a0   : > { %v1039_v29 = vpop.permute.xlu1 %1038  ;;  %v911_v58 = vpop.permute.xlu0 %910 }
 0x1a1   : > { %957 = vst.msk [vmem:[#allocation2 + $0x10] sm:$0xf] %vm954_vm9, %v911_v58 }
 0x1a2   : > { %1132 = vrot.lane.b32.xlu1 %v3103_v42, %s2672_s10  ;;  %1130 = vrot.lane.b32.xlu0 %v3105_v45, %s2672_s10  ;;  %1087 = vst.msk [vmem:[#allocation2 + $0x10] sm:$0xf] %vm1084_vm10, %v1041_v23 }
 0x1a4   : > { %v1190_v26 = vpop.permute.xlu1 %1189  ;;  %v3339_v28 = vpop.permute.xlu0 %1334 }
 0x1a6   : > { %1421 = vrot.lane.b32.xlu1 %v2191_v27, %s2679_s17  ;;  %1419 = vrot.lane.b32.xlu0 %v2190_v30, %s2679_s17 }
 0x1a8   : > { %v913_v31 = vpop.permute.xlu1 %912  ;;  %v3345_v42 = vpop.permute.xlu0 %1114 }
 0x1a9   : > { %958 = vst.msk [vmem:[#allocation2 + $0x18] sm:$0xf] %vm954_vm9, %v913_v31 }
 0x1aa   : > { %1201 = vrot.lane.b32.xlu1 %v2191_v27, %s2675_s22  ;;  %1088 = vst.msk [vmem:[#allocation2 + $0x18] sm:$0xf] %vm1084_vm10, %v1043_v22  ;;  %1199 = vrot.lane.b32.xlu0 %v2190_v30, %s2675_s22  ;;  %v2216_v22 = vcombine.low %v3285_v48, %v3285_v48  ;;  %v2223_v48 = vcombine.high %v3295_v16, %v3295_v16 }
 0x1ac   : > { %v3351_v45 = vpop.permute.xlu1 %1336  ;;  %v907_v33 = vpop.permute.xlu0 %906 }
 0x1ad   : > { %955 = vst.msk [vmem:[#allocation2] sm:$0xf] %vm954_vm9, %v907_v33 }
 0x1ae   : > { %924 = vrot.lane.b32.xlu1 %v2191_v27, %s2676_s21  ;;  %1085 = vst.msk [vmem:[#allocation2] sm:$0xf] %vm1084_vm10, %v1037_v18  ;;  %922 = vrot.lane.b32.xlu0 %v2190_v30, %s2676_s21 }
 0x1af   : > { %1155 = vst.msk [vmem:[#allocation2] sm:$0xf] %vm1154_vm11, %v1107_v4 }
 0x1b0   : > { %v3358_v0 = vpop.permute.xlu1 %1116  ;;  %v909_v60 = vpop.permute.xlu0 %908  ;;  %1236 = vst.msk [vmem:[#allocation2] sm:$0xf] %vm1235_vm12, %v1188_v24 }
 0x1b1   : > { %956 = vst.msk [vmem:[#allocation2 + $0x8] sm:$0xf] %vm954_vm9, %v909_v60 }
 0x1b2   : > { %1348 = vrot.lane.b32.xlu1 %v3111_v47, %s2677_s14  ;;  %1309 = vst.msk [vmem:[#allocation2] sm:$0xf] %vm1308_vm13, %v1261_v17  ;;  %1346 = vrot.lane.b32.xlu0 %v3115_v49, %s2677_s14 }
 0x1b3   : > { %1086 = vst.msk [vmem:[#allocation2 + $0x8] sm:$0xf] %vm1084_vm10, %v1039_v29  ;;  %v2222_v29 = vcombine.low %v3295_v16, %v3295_v16 }
 0x1b4   : > { %1156 = vst.msk [vmem:[#allocation2 + $0x8] sm:$0xf] %vm1154_vm11, %v1109_v57  ;;  %v1333_v12 = vpop.permute.xlu1 %1332  ;;  %v1331_v21 = vpop.permute.xlu0 %1330 }
 0x1b5   : > { %1237 = vst.msk [vmem:[#allocation2 + $0x8] sm:$0xf] %vm1235_vm12, %v1190_v26 }
 0x1b6   : > { %1310 = vst.msk [vmem:[#allocation2 + $0x8] sm:$0xf] %vm1308_vm13, %v1263_v56  ;;  %1128 = vrot.lane.b32.xlu1 %v3111_v47, %s2672_s10  ;;  %1126 = vrot.lane.b32.xlu0 %v3115_v49, %s2672_s10  ;;  %v2500_v56 = vld [vmem:[#allocation2 + $0x14] ss:$8 sps:$4 sm:$0xff]  }
 0x1b7   : > { %1379 = vst.msk [vmem:[#allocation2] sm:$0xf] %vm1378_vm14, %v1331_v21  ;;  %1380 = vst.msk [vmem:[#allocation2 + $0x8] sm:$0xf] %vm1378_vm14, %v1333_v12 }
 0x1b8   : > { %v1113_v52 = vpop.permute.xlu1 %1112  ;;  %v1111_v34 = vpop.permute.xlu0 %1110 }
 0x1b9   : > { %1158 = vst.msk [vmem:[#allocation2 + $0x18] sm:$0xf] %vm1154_vm11, %v1113_v52  ;;  %1157 = vst.msk [vmem:[#allocation2 + $0x10] sm:$0xf] %vm1154_vm11, %v1111_v34 }
 0x1ba   : > { %1286 = vrot.lane.b32.xlu1 %v3139_v9, %s2673_s26  ;;  %1284 = vrot.lane.b32.xlu0 %v3141_v13, %s2673_s26 }
 0x1bc   : > { %v3383_v36 = vpop.permute.xlu1 %1270  ;;  %v3385_v47 = vpop.permute.xlu0 %1268 }
 0x1be   : > { %1066 = vrot.lane.b32.xlu1 %v3139_v9, %s2674_s29  ;;  %1064 = vrot.lane.b32.xlu0 %v3141_v13, %s2674_s29  ;;  %v2197_v13 = vcombine.high %v3180_v50, %v3180_v50  ;;  %v2195_v50 = vcombine.high %v3194_v10, %v3194_v10 }
 0x1c0   : > { %v1051_v49 = vpop.permute.xlu1 %1050  ;;  %v1049_v37 = vpop.permute.xlu0 %1048 }
 0x1c2   : > { %1282 = vrot.lane.b32.xlu1 %v3143_v14, %s2673_s26  ;;  %1280 = vrot.lane.b32.xlu0 %v3145_v15, %s2673_s26 }
 0x1c4   : > { %v1267_v19 = vpop.permute.xlu1 %1266  ;;  %v1265_v38 = vpop.permute.xlu0 %1264 }
 0x1c6   : > { %1062 = vrot.lane.b32.xlu1 %v3143_v14, %s2674_s29  ;;  %1060 = vrot.lane.b32.xlu0 %v3145_v15, %s2674_s29  ;;  %s2680_s29 = smov [#allocation6]  }
 0x1c8   : > { %v1047_v9 = vpop.permute.xlu1 %1046  ;;  %v3401_v44 = vpop.permute.xlu0 %1044 }
 0x1ca   : > { %1433 = vrot.lane.b32.xlu1 %v2197_v13, %s2679_s17  ;;  %1431 = vrot.lane.b32.xlu0 %v2196_v51, %s2679_s17 }
 0x1cc   : > { %v1418_v41 = vpop.permute.xlu1 %1417  ;;  %v1416_v46 = vpop.permute.xlu0 %1415 }
 0x1ce   : > { %1213 = vrot.lane.b32.xlu1 %v2197_v13, %s2675_s22  ;;  %1211 = vrot.lane.b32.xlu0 %v2196_v51, %s2675_s22 }
 0x1d0   : > { %v1198_v14 = vpop.permute.xlu1 %1197  ;;  %v1196_v15 = vpop.permute.xlu0 %1195 }
 0x1d2   : > { %936 = vrot.lane.b32.xlu1 %v2197_v13, %s2676_s21  ;;  %934 = vrot.lane.b32.xlu0 %v2196_v51, %s2676_s21 }
 0x1d4   : > { %v921_v35 = vpop.permute.xlu1 %920  ;;  %v919_v39 = vpop.permute.xlu0 %918 }
 0x1d5   : > { %962 = vst.msk [vmem:[#allocation2 + $0x38] sm:$0xf] %vm954_vm9, %v921_v35  ;;  %961 = vst.msk [vmem:[#allocation2 + $0x30] sm:$0xf] %vm954_vm9, %v919_v39 }
 0x1d6   : > { %1092 = vst.msk [vmem:[#allocation2 + $0x38] sm:$0xf] %vm1084_vm10, %v1051_v49  ;;  %1429 = vrot.lane.b32.xlu1 %v2195_v50, %s2679_s17  ;;  %1091 = vst.msk [vmem:[#allocation2 + $0x30] sm:$0xf] %vm1084_vm10, %v1049_v37  ;;  %1427 = vrot.lane.b32.xlu0 %v2194_v61, %s2679_s17 }
 0x1d8   : > { %v3421_v62 = vpop.permute.xlu1 %1344  ;;  %v3423_v53 = vpop.permute.xlu0 %1342 }
 0x1da   : > { %1209 = vrot.lane.b32.xlu1 %v2195_v50, %s2675_s22  ;;  %1207 = vrot.lane.b32.xlu0 %v2194_v61, %s2675_s22 }
 0x1dc   : > { %v3427_v54 = vpop.permute.xlu1 %1124  ;;  %v3429_v10 = vpop.permute.xlu0 %1122 }
 0x1de   : > { %932 = vrot.lane.b32.xlu1 %v2195_v50, %s2676_s21  ;;  %930 = vrot.lane.b32.xlu0 %v2194_v61, %s2676_s21  ;;  %s308_s21 = sand.u32 1, %s2631_s25  }
 0x1df   : > { %s2148_s27 = sshll.u32 %s308_s21, 7 }
 0x1e0   : > { %v1414_v43 = vpop.permute.xlu1 %1413  ;;  %v1412_v63 = vpop.permute.xlu0 %1411  ;;  %s3633_s12 = scalar_lea.vmem [#allocation6], %s2148_s27 }
 0x1e1   : > { %1461 = vst.msk [vmem:[#allocation2 + $0x8] sm:$0xf] %vm1459_vm15, %v1414_v43  ;;  %1460 = vst.msk [vmem:[#allocation2] sm:$0xf] %vm1459_vm15, %v1412_v63  ;;  %v2518_v63 = vld [vmem:[%s3769_s5] sm:$0xff]   ;;  %s2049_s8 = sshll.u32 %s3633_s12, 4  ;;  %s3696_s8 = int_to_ptr.vmem [resolvable:$true] %s2049_s8 }
 0x1e2   : > { %1360 = vrot.lane.b32.xlu1 %v2221_v55, %s2677_s14  ;;  %1358 = vrot.lane.b32.xlu0 %v2220_v1, %s2677_s14 }
 0x1e3   : > { %2349 = vmatprep.subr.bf16.mxu0 %v2518_v63 }
 0x1e4   : > { %v1194_v2 = vpop.permute.xlu1 %1193  ;;  %v1192_v6 = vpop.permute.xlu0 %1191  ;;  %2350 = vmatpush3.bf16.msra.mxu0 %v2518_v63 }
 0x1e5   : > { %1239 = vst.msk [vmem:[#allocation2 + $0x18] sm:$0xf] %vm1235_vm12, %v1194_v2  ;;  %1238 = vst.msk [vmem:[#allocation2 + $0x10] sm:$0xf] %vm1235_vm12, %v1192_v6 }
 0x1e6   : > { %1312 = vst.msk [vmem:[#allocation2 + $0x18] sm:$0xf] %vm1308_vm13, %v1267_v19  ;;  %1356 = vrot.lane.b32.xlu1 %v2215_v3, %s2677_s14  ;;  %1311 = vst.msk [vmem:[#allocation2 + $0x10] sm:$0xf] %vm1308_vm13, %v1265_v38  ;;  %1354 = vrot.lane.b32.xlu0 %v2214_v7, %s2677_s14 }
 0x1e7   : > { %1382 = vst.msk [vmem:[#allocation2 + $0x18] sm:$0xf] %vm1378_vm14, %v3351_v45  ;;  %1381 = vst.msk [vmem:[#allocation2 + $0x10] sm:$0xf] %vm1378_vm14, %v3339_v28 }
 0x1e8   : > { %1463 = vst.msk [vmem:[#allocation2 + $0x18] sm:$0xf] %vm1459_vm15, %v1418_v41  ;;  %v917_v25 = vpop.permute.xlu1 %916  ;;  %1462 = vst.msk [vmem:[#allocation2 + $0x10] sm:$0xf] %vm1459_vm15, %v1416_v46  ;;  %v915_v20 = vpop.permute.xlu0 %914  ;;  %v2497_v11 = vld [vmem:[#allocation2] ss:$8 sps:$4 sm:$0xff]  }
 0x1e9   : > { %960 = vst.msk [vmem:[#allocation2 + $0x28] sm:$0xf] %vm954_vm9, %v917_v25  ;;  %959 = vst.msk [vmem:[#allocation2 + $0x20] sm:$0xf] %vm954_vm9, %v915_v20  ;;  %1741 = vmatmul.mubr.bf16.vlgmr.msra.gmra.mxu1 %v2497_v11  ;;  %v2505_v46 = vld [vmem:[#allocation2 + $0x34] ss:$8 sps:$4 sm:$0xff]  }
 0x1ea   : > { %1090 = vst.msk [vmem:[#allocation2 + $0x28] sm:$0xf] %vm1084_vm10, %v1047_v9  ;;  %1136 = vrot.lane.b32.xlu1 %v2215_v3, %s2672_s10  ;;  %1089 = vst.msk [vmem:[#allocation2 + $0x20] sm:$0xf] %vm1084_vm10, %v3401_v44  ;;  %1134 = vrot.lane.b32.xlu0 %v2214_v7, %s2672_s10  ;;  %v2503_v9 = vld [vmem:[#allocation2 + $0x24] ss:$8 sps:$4 sm:$0xff]   ;;  %s3694_s10 = scalar_lea.hbm %s3771_s7, %s2292_s30 }
 0x1eb   : > { %1160 = vst.msk [vmem:[#allocation2 + $0x28] sm:$0xf] %vm1154_vm11, %v3358_v0  ;;  %1159 = vst.msk [vmem:[#allocation2 + $0x20] sm:$0xf] %vm1154_vm11, %v3345_v42  ;;  %2253 = vmatprep.mubr.msk.bf16.mxu1 %vm1683_vm1, %v2500_v56 }
 0x1ec   : > { %1241 = vst.msk [vmem:[#allocation2 + $0x28] sm:$0xf] %vm1235_vm12, %v1198_v14  ;;  %v1341_v57 = vpop.permute.xlu1 %1340  ;;  %1240 = vst.msk [vmem:[#allocation2 + $0x20] sm:$0xf] %vm1235_vm12, %v1196_v15  ;;  %v1339_v59 = vpop.permute.xlu0 %1338 }
 0x1ed   : > { %1314 = vst.msk [vmem:[#allocation2 + $0x28] sm:$0xf] %vm1308_vm13, %v3383_v36  ;;  %1313 = vst.msk [vmem:[#allocation2 + $0x20] sm:$0xf] %vm1308_vm13, %v3385_v47 }
 0x1ee   : > { %1384 = vst.msk [vmem:[#allocation2 + $0x28] sm:$0xf] %vm1378_vm14, %v1341_v57  ;;  %1290 = vrot.lane.b32.xlu1 %v3272_v32, %s2673_s26  ;;  %1383 = vst.msk [vmem:[#allocation2 + $0x20] sm:$0xf] %vm1378_vm14, %v1339_v59  ;;  %1288 = vrot.lane.b32.xlu0 %v3274_v40, %s2673_s26  ;;  %s2547_s26 = scalar_lea.vmem %s3696_s8, 2048 }
 0x1ef   : > { %v2502_v32 = vld [vmem:[#allocation2 + $0x10] ss:$8 sps:$4 sm:$0xff]   ;;  %p2548_p5 = scmp.ne.s32.totalorder %s3696_s8, %s2547_s26 }
 0x1f0   : > { %v1121_v4 = vpop.permute.xlu1 %1120  ;;  %v1119_v17 = vpop.permute.xlu0 %1118 }
 0x1f1   : > { %1162 = vst.msk [vmem:[#allocation2 + $0x38] sm:$0xf] %vm1154_vm11, %v1121_v4  ;;  %1161 = vst.msk [vmem:[#allocation2 + $0x30] sm:$0xf] %vm1154_vm11, %v1119_v17  ;;  %1749 = vmatmul.mubr.bf16.gmra.mxu1 %v2502_v32  ;;  %p2549_p8 = pnand %p2548_p5, %p2805_p12 }
 0x1f2   : > { %1437 = vrot.lane.b32.xlu1 %v2217_v5, %s2679_s17  ;;  %1435 = vrot.lane.b32.xlu0 %v2216_v22, %s2679_s17 }
 0x1f3   : > { %2254 = vmatprep.mubr.msk.bf16.mxu1 %vm1683_vm1, %v2503_v9  ;;  %p2550_p9 = pneg %p2549_p8 }
 0x1f4   : > { %v1279_v40 = vpop.permute.xlu1 %1278  ;;  %v1277_v23 = vpop.permute.xlu0 %1276 }
 0x1f6   : > { %1217 = vrot.lane.b32.xlu1 %v2217_v5, %s2675_s22  ;;  %1215 = vrot.lane.b32.xlu0 %v2216_v22, %s2675_s22  ;;  %v2508_v5 = vld [vmem:[#allocation2 + $0x44] ss:$8 sps:$4 sm:$0xff]   ;;  %s2551_s22 = sshll.u32 %s2680_s29, 4  ;;  %s2552_s22 = int_to_ptr.vmem [resolvable:$false] %s2551_s22 }
 0x1f7   : > { %s2553_s14 = scalar_lea.vmem %s2552_s22, 4096  ;;  %p2554_p10 = scmp.lt.s32.totalorder %s3696_s8, %s2552_s22 }
 0x1f8   : > { %v1059_v18 = vpop.permute.xlu1 %1058  ;;  %v1057_v24 = vpop.permute.xlu0 %1056  ;;  %p2555_p3 = scmp.lt.s32.totalorder %s2553_s14, %s2547_s26 }
 0x1fa   : > { %1441 = vrot.lane.b32.xlu1 %v2223_v48, %s2679_s17  ;;  %1439 = vrot.lane.b32.xlu0 %v2222_v29, %s2679_s17  ;;  %p2556_p11 = por %p2555_p3, %p2554_p10 }
 0x1fc   : > { %v1275_v58 = vpop.permute.xlu1 %1274  ;;  %v1273_v26 = vpop.permute.xlu0 %1272  ;;  %p2557_p13 = pnand %p2556_p11, %p2550_p9 }
 0x200   : > { %v1055_v27 = vpop.permute.xlu1 %1054  ;;  %v1053_v28 = vpop.permute.xlu0 %1052 }
 0x204   : > { %v1426_v30 = vpop.permute.xlu1 %1425  ;;  %v1424_v31 = vpop.permute.xlu0 %1423 }
 0x208   : > { %v1206_v42 = vpop.permute.xlu1 %1205  ;;  %v1204_v45 = vpop.permute.xlu0 %1203 }
 0x20c   : > { %v929_v33 = vpop.permute.xlu1 %928  ;;  %v927_v0 = vpop.permute.xlu0 %926 }
 0x20d   : > { %966 = vst.msk [vmem:[#allocation2 + $0x58] sm:$0xf] %vm954_vm9, %v929_v33  ;;  %965 = vst.msk [vmem:[#allocation2 + $0x50] sm:$0xf] %vm954_vm9, %v927_v0  ;;  %v2512_v0 = vld [vmem:[#allocation2 + $0x64] ss:$8 sps:$4 sm:$0xff]  }
 0x20e   : > { %1096 = vst.msk [vmem:[#allocation2 + $0x58] sm:$0xf] %vm1084_vm10, %v1059_v18  ;;  %1095 = vst.msk [vmem:[#allocation2 + $0x50] sm:$0xf] %vm1084_vm10, %v1057_v24  ;;  %v2510_v18 = vld [vmem:[#allocation2 + $0x54] ss:$8 sps:$4 sm:$0xff]  }
 0x210   : > { %v3502_v16 = vpop.permute.xlu1 %1352  ;;  %v3504_v60 = vpop.permute.xlu0 %1350 }
 0x214   : > { %v3506_v12 = vpop.permute.xlu1 %1132  ;;  %v3508_v21 = vpop.permute.xlu0 %1130 }
 0x218   : > { %v1422_v52 = vpop.permute.xlu1 %1421  ;;  %v1420_v34 = vpop.permute.xlu0 %1419 }
 0x219   : > { %1465 = vst.msk [vmem:[#allocation2 + $0x28] sm:$0xf] %vm1459_vm15, %v1422_v52  ;;  %1464 = vst.msk [vmem:[#allocation2 + $0x20] sm:$0xf] %vm1459_vm15, %v1420_v34 }
 0x21c   : > { %v1202_v36 = vpop.permute.xlu1 %1201  ;;  %v1200_v47 = vpop.permute.xlu0 %1199 }
 0x21d   : > { %1243 = vst.msk [vmem:[#allocation2 + $0x38] sm:$0xf] %vm1235_vm12, %v1202_v36  ;;  %1242 = vst.msk [vmem:[#allocation2 + $0x30] sm:$0xf] %vm1235_vm12, %v1200_v47 }
 0x21e   : > { %1316 = vst.msk [vmem:[#allocation2 + $0x38] sm:$0xf] %vm1308_vm13, %v1275_v58  ;;  %1315 = vst.msk [vmem:[#allocation2 + $0x30] sm:$0xf] %vm1308_vm13, %v1273_v26 }
 0x21f   : > { %1386 = vst.msk [vmem:[#allocation2 + $0x38] sm:$0xf] %vm1378_vm14, %v3421_v62  ;;  %1385 = vst.msk [vmem:[#allocation2 + $0x30] sm:$0xf] %vm1378_vm14, %v3423_v53 }
 0x220   : > { %1467 = vst.msk [vmem:[#allocation2 + $0x38] sm:$0xf] %vm1459_vm15, %v1426_v30  ;;  %v925_v49 = vpop.permute.xlu1 %924  ;;  %v1521_v37 = vld [vmem:[#allocation2 + $0x28] sm:$0xff]  ;;  %1466 = vst.msk [vmem:[#allocation2 + $0x30] sm:$0xf] %vm1459_vm15, %v1424_v31  ;;  %v923_v19 = vpop.permute.xlu0 %922  ;;  %v1520_v38 = vld [vmem:[#allocation2 + $0x20] sm:$0xff] }
 0x221   : > { %964 = vst.msk [vmem:[#allocation2 + $0x48] sm:$0xf] %vm954_vm9, %v925_v49  ;;  %963 = vst.msk [vmem:[#allocation2 + $0x40] sm:$0xf] %vm954_vm9, %v923_v19  ;;  %v2231_v13 = vcombine.low %v1520_v38, %v1521_v37 }
 0x222   : > { %1094 = vst.msk [vmem:[#allocation2 + $0x48] sm:$0xf] %vm1084_vm10, %v1055_v27  ;;  %1093 = vst.msk [vmem:[#allocation2 + $0x40] sm:$0xf] %vm1084_vm10, %v1053_v28 }
 0x223   : > { %1164 = vst.msk [vmem:[#allocation2 + $0x48] sm:$0xf] %vm1154_vm11, %v3427_v54  ;;  %1163 = vst.msk [vmem:[#allocation2 + $0x40] sm:$0xf] %vm1154_vm11, %v3429_v10  ;;  %1757 = vmatmul.mubr.bf16.gmra.mxu1 %v2231_v13 }
 0x224   : > { %1245 = vst.msk [vmem:[#allocation2 + $0x48] sm:$0xf] %vm1235_vm12, %v1206_v42  ;;  %v1349_v44 = vpop.permute.xlu1 %1348  ;;  %1244 = vst.msk [vmem:[#allocation2 + $0x40] sm:$0xf] %vm1235_vm12, %v1204_v45  ;;  %v1347_v51 = vpop.permute.xlu0 %1346  ;;  %2255 = vmatprep.mubr.msk.bf16.mxu1 %vm1683_vm1, %v2505_v46 }
 0x225   : > { %1318 = vst.msk [vmem:[#allocation2 + $0x48] sm:$0xf] %vm1308_vm13, %v1279_v40  ;;  %1317 = vst.msk [vmem:[#allocation2 + $0x40] sm:$0xf] %vm1308_vm13, %v1277_v23 }
 0x226   : > { %1388 = vst.msk [vmem:[#allocation2 + $0x48] sm:$0xf] %vm1378_vm14, %v1349_v44  ;;  %1387 = vst.msk [vmem:[#allocation2 + $0x40] sm:$0xf] %vm1378_vm14, %v1347_v51 }
 0x227   : > { %v2507_v15 = vld [vmem:[#allocation2 + $0x30] ss:$8 sps:$4 sm:$0xff]  }
 0x228   : > { %v1129_v41 = vpop.permute.xlu1 %1128  ;;  %v1127_v14 = vpop.permute.xlu0 %1126 }
 0x229   : > { %1166 = vst.msk [vmem:[#allocation2 + $0x58] sm:$0xf] %vm1154_vm11, %v1129_v41  ;;  %1165 = vst.msk [vmem:[#allocation2 + $0x50] sm:$0xf] %vm1154_vm11, %v1127_v14 }
 0x22b   : > { %1765 = vmatmul.mubr.bf16.gmra.mxu1 %v2507_v15 }
 0x22c   : > { %v1287_v35 = vpop.permute.xlu1 %1286  ;;  %v1285_v50 = vpop.permute.xlu0 %1284  ;;  %2256 = vmatprep.mubr.msk.bf16.mxu1 %vm1683_vm1, %v2508_v5 }
 0x230   : > { %v1067_v39 = vpop.permute.xlu1 %1066  ;;  %v1065_v61 = vpop.permute.xlu0 %1064 }
 0x234   : > { %v1283_v62 = vpop.permute.xlu1 %1282  ;;  %v1281_v53 = vpop.permute.xlu0 %1280 }
 0x238   : > { %v1063_v54 = vpop.permute.xlu1 %1062  ;;  %v1061_v10 = vpop.permute.xlu0 %1060 }
 0x23c   : > { %v1434_v43 = vpop.permute.xlu1 %1433  ;;  %v1432_v55 = vpop.permute.xlu0 %1431 }
 0x240   : > { %v1214_v1 = vpop.permute.xlu1 %1213  ;;  %v1212_v2 = vpop.permute.xlu0 %1211 }
 0x244   : > { %v937_v3 = vpop.permute.xlu1 %936  ;;  %v935_v6 = vpop.permute.xlu0 %934 }
 0x245   : > { %970 = vst.msk [vmem:[#allocation2 + $0x78] sm:$0xf] %vm954_vm9, %v937_v3  ;;  %969 = vst.msk [vmem:[#allocation2 + $0x70] sm:$0xf] %vm954_vm9, %v935_v6 }
 0x246   : > { %1100 = vst.msk [vmem:[#allocation2 + $0x78] sm:$0xf] %vm1084_vm10, %v1067_v39  ;;  %1099 = vst.msk [vmem:[#allocation2 + $0x70] sm:$0xf] %vm1084_vm10, %v1065_v61 }
 0x248   : > { %v1430_v7 = vpop.permute.xlu1 %1429  ;;  %v1428_v25 = vpop.permute.xlu0 %1427 }
 0x249   : > { %1469 = vst.msk [vmem:[#allocation2 + $0x48] sm:$0xf] %vm1459_vm15, %v1430_v7  ;;  %1468 = vst.msk [vmem:[#allocation2 + $0x40] sm:$0xf] %vm1459_vm15, %v1428_v25 }
 0x24c   : > { %v1210_v20 = vpop.permute.xlu1 %1209  ;;  %v1208_v11 = vpop.permute.xlu0 %1207 }
 0x24d   : > { %1247 = vst.msk [vmem:[#allocation2 + $0x58] sm:$0xf] %vm1235_vm12, %v1210_v20  ;;  %1246 = vst.msk [vmem:[#allocation2 + $0x50] sm:$0xf] %vm1235_vm12, %v1208_v11 }
 0x24e   : > { %1320 = vst.msk [vmem:[#allocation2 + $0x58] sm:$0xf] %vm1308_vm13, %v1283_v62  ;;  %1319 = vst.msk [vmem:[#allocation2 + $0x50] sm:$0xf] %vm1308_vm13, %v1281_v53 }
 0x24f   : > { %1390 = vst.msk [vmem:[#allocation2 + $0x58] sm:$0xf] %vm1378_vm14, %v3502_v16  ;;  %1389 = vst.msk [vmem:[#allocation2 + $0x50] sm:$0xf] %vm1378_vm14, %v3504_v60  ;;  %v2515_v60 = vld [vmem:[#allocation2 + $0x74] ss:$8 sps:$4 sm:$0xff]  }
 0x250   : > { %1471 = vst.msk [vmem:[#allocation2 + $0x58] sm:$0xf] %vm1459_vm15, %v1434_v43  ;;  %v933_v8 = vpop.permute.xlu1 %932  ;;  %v1525_v57 = vld [vmem:[#allocation2 + $0x48] sm:$0xff]  ;;  %1470 = vst.msk [vmem:[#allocation2 + $0x50] sm:$0xf] %vm1459_vm15, %v1432_v55  ;;  %v931_v59 = vpop.permute.xlu0 %930  ;;  %v1524_v4 = vld [vmem:[#allocation2 + $0x40] sm:$0xff] }
 0x251   : > { %968 = vst.msk [vmem:[#allocation2 + $0x68] sm:$0xf] %vm954_vm9, %v933_v8  ;;  %967 = vst.msk [vmem:[#allocation2 + $0x60] sm:$0xf] %vm954_vm9, %v931_v59  ;;  %v2235_v56 = vcombine.low %v1524_v4, %v1525_v57 }
 0x252   : > { %1098 = vst.msk [vmem:[#allocation2 + $0x68] sm:$0xf] %vm1084_vm10, %v1063_v54  ;;  %1097 = vst.msk [vmem:[#allocation2 + $0x60] sm:$0xf] %vm1084_vm10, %v1061_v10 }
 0x253   : > { %1168 = vst.msk [vmem:[#allocation2 + $0x68] sm:$0xf] %vm1154_vm11, %v3506_v12  ;;  %1167 = vst.msk [vmem:[#allocation2 + $0x60] sm:$0xf] %vm1154_vm11, %v3508_v21  ;;  %1773 = vmatmul.mubr.bf16.gmra.mxu1 %v2235_v56  ;;  %v3592_v21 = vld [vmem:[%s3768_s4] ss:$0 sm:$0xff] }
 0x254   : > { %1249 = vst.msk [vmem:[#allocation2 + $0x68] sm:$0xf] %vm1235_vm12, %v1214_v1  ;;  %v1361_v17 = vpop.permute.xlu1 %1360  ;;  %1248 = vst.msk [vmem:[#allocation2 + $0x60] sm:$0xf] %vm1235_vm12, %v1212_v2  ;;  %v1359_v22 = vpop.permute.xlu0 %1358  ;;  %2257 = vmatprep.mubr.msk.bf16.mxu1 %vm1683_vm1, %v2510_v18 }
 0x255   : > { %1322 = vst.msk [vmem:[#allocation2 + $0x68] sm:$0xf] %vm1308_vm13, %v1287_v35  ;;  %1321 = vst.msk [vmem:[#allocation2 + $0x60] sm:$0xf] %vm1308_vm13, %v1285_v50 }
 0x257   : > { %v1527_v32 = vld [vmem:[#allocation2 + $0x58] sm:$0xff]  ;;  %v1526_v23 = vld [vmem:[#allocation2 + $0x50] sm:$0xff] }
 0x258   : > { %v1357_v40 = vpop.permute.xlu1 %1356  ;;  %v1355_v48 = vpop.permute.xlu0 %1354  ;;  %v2237_v24 = vcombine.low %v1526_v23, %v1527_v32 }
 0x259   : > { %1392 = vst.msk [vmem:[#allocation2 + $0x68] sm:$0xf] %vm1378_vm14, %v1357_v40  ;;  %1391 = vst.msk [vmem:[#allocation2 + $0x60] sm:$0xf] %vm1378_vm14, %v1355_v48 }
 0x25b   : > { %1781 = vmatmul.mubr.bf16.gmra.mxu1 %v2237_v24 }
 0x25c   : > { %v1137_v29 = vpop.permute.xlu1 %1136  ;;  %v1135_v58 = vpop.permute.xlu0 %1134  ;;  %2258 = vmatprep.mubr.msk.bf16.mxu1 %vm1683_vm1, %v2512_v0 }
 0x25d   : > { %1170 = vst.msk [vmem:[#allocation2 + $0x78] sm:$0xf] %vm1154_vm11, %v1137_v29  ;;  %1169 = vst.msk [vmem:[#allocation2 + $0x70] sm:$0xf] %vm1154_vm11, %v1135_v58 }
 0x260   : > { %v1291_v26 = vpop.permute.xlu1 %1290  ;;  %v1289_v27 = vpop.permute.xlu0 %1288 }
 0x264   : > { %v1438_v28 = vpop.permute.xlu1 %1437  ;;  %v1436_v30 = vpop.permute.xlu0 %1435 }
 0x265   : > { %1473 = vst.msk [vmem:[#allocation2 + $0x68] sm:$0xf] %vm1459_vm15, %v1438_v28  ;;  %1472 = vst.msk [vmem:[#allocation2 + $0x60] sm:$0xf] %vm1459_vm15, %v1436_v30 }
 0x268   : > { %v1218_v31 = vpop.permute.xlu1 %1217  ;;  %v1216_v42 = vpop.permute.xlu0 %1215 }
 0x269   : > { %1251 = vst.msk [vmem:[#allocation2 + $0x78] sm:$0xf] %vm1235_vm12, %v1218_v31  ;;  %1250 = vst.msk [vmem:[#allocation2 + $0x70] sm:$0xf] %vm1235_vm12, %v1216_v42 }
 0x26a   : > { %1324 = vst.msk [vmem:[#allocation2 + $0x78] sm:$0xf] %vm1308_vm13, %v1291_v26  ;;  %1323 = vst.msk [vmem:[#allocation2 + $0x70] sm:$0xf] %vm1308_vm13, %v1289_v27 }
 0x26b   : > { %1394 = vst.msk [vmem:[#allocation2 + $0x78] sm:$0xf] %vm1378_vm14, %v1361_v17  ;;  %1393 = vst.msk [vmem:[#allocation2 + $0x70] sm:$0xf] %vm1378_vm14, %v1359_v22 }
 0x26c   : > { %v1442_v45 = vpop.permute.xlu1 %1441  ;;  %v1440_v33 = vpop.permute.xlu0 %1439  ;;  %v2514_v16 = vld [vmem:[#allocation2 + $0x60] ss:$8 sps:$4 sm:$0xff]  }
 0x26d   : > { %1475 = vst.msk [vmem:[#allocation2 + $0x78] sm:$0xf] %vm1459_vm15, %v1442_v45  ;;  %1474 = vst.msk [vmem:[#allocation2 + $0x70] sm:$0xf] %vm1459_vm15, %v1440_v33  ;;  %1789 = vmatmul.mubr.bf16.gmra.mxu1 %v2514_v16 }
 0x26e   : > { %2259 = vmatprep.mubr.msk.bf16.mxu1 %vm1683_vm1, %v2515_v60 }
 0x274   : > { %v2517_v12 = vld [vmem:[#allocation2 + $0x70] ss:$8 sps:$4 sm:$0xff]  }
 0x275   : > { %1797 = vmatmul.mubr.bf16.gmra.mxu1 %v2517_v12 }
 0x2a9   : > { %v1742_v52 = vpop.f32.mrf.mxu1 }
 0x2aa   : > { %v1743_v36 = vadd.f32 %v3592_v21, %v1742_v52 }
 0x2ab   : > { %v1744_v34 = vpop.f32.mrf.mxu1 }
 0x2ac   : > { %v1805_v19 = vmax.f32 %v1743_v36, 0.0 }
 0x2ad   : > { %v1745_v47 = vpop.f32.mrf.mxu1 }
 0x2ae   : > { %v1746_v49 = vadd.f32 %v3592_v21, %v1745_v47 }
 0x2af   : > { %v1747_v37 = vpop.f32.mrf.mxu1 }
 0x2b0   : > { %v1806_v38 = vmax.f32 %v1746_v49, 0.0 }
 0x2b1   : > { %v1750_v9 = vpop.f32.mrf.mxu1 }
 0x2b2   : > { %v1821_v13 = vpack.c.bf16 %v1806_v38, %v1805_v19  ;;  %v1751_v51 = vadd.f32 %v3592_v21, %v1750_v9 }
 0x2b3   : > { %v1752_v44 = vpop.f32.mrf.mxu1 }
 0x2b4   : > { %2351 = vmatprep.mubr.msk.bf16.mxu0 %vm1683_vm1, %v1821_v13  ;;  %v1807_v15 = vmax.f32 %v1751_v51, 0.0  ;;  %v3622_v13 = vld [vmem:[%s3770_s6] ss:$0 sm:$0xff] }
 0x2b5   : > { %v1753_v41 = vpop.f32.mrf.mxu1  ;;  %v2274_v51 = vld [vmem:[%s2853_s19 + $0x20] sm:$0xff] }
 0x2b6   : > { %v1754_v46 = vadd.f32 %v3592_v21, %v1753_v41 }
 0x2b7   : > { %v1755_v14 = vpop.f32.mrf.mxu1 }
 0x2b8   : > { %v1808_v35 = vmax.f32 %v1754_v46, 0.0  ;;  %v2272_v46 = vld [vmem:[%s2853_s19 + $0x10] sm:$0xff] }
 0x2ba   : > { %v1822_v50 = vpack.c.bf16 %v1808_v35, %v1807_v15 }
 0x2bc   : > { %2352 = vmatmul.mubr.msk.bf16.vlgmr.msra.gmra.mxu0 %vm1683_vm1, %v1822_v50  ;;  %v2275_v50 = vld [vmem:[%s2853_s19 + $0x28] sm:$0xff] }
 0x2e3   : > { %v1758_v39 = vpop.f32.mrf.mxu1 }
 0x2e4   : > { %v1759_v62 = vadd.f32 %v3592_v21, %v1758_v39 }
 0x2e5   : > { %v1760_v61 = vpop.f32.mrf.mxu1 }
 0x2e6   : > { %v1809_v43 = vmax.f32 %v1759_v62, 0.0 }
 0x2e7   : > { %v1761_v53 = vpop.f32.mrf.mxu1 }
 0x2e8   : > { %v1762_v54 = vadd.f32 %v3592_v21, %v1761_v53 }
 0x2e9   : > { %v1763_v10 = vpop.f32.mrf.mxu1 }
 0x2ea   : > { %v1810_v55 = vmax.f32 %v1762_v54, 0.0  ;;  %v2273_v54 = vld [vmem:[%s2853_s19 + $0x18] sm:$0xff] }
 0x2eb   : > { %v1766_v63 = vpop.f32.mrf.mxu1 }
 0x2ec   : > { %v1823_v1 = vpack.c.bf16 %v1810_v55, %v1809_v43  ;;  %v1767_v3 = vadd.f32 %v3592_v21, %v1766_v63 }
 0x2ed   : > { %v1768_v2 = vpop.f32.mrf.mxu1 }
 0x2ee   : > { %2355 = vmatprep.mubr.msk.bf16.mxu0 %vm1683_vm1, %v1823_v1  ;;  %v1811_v20 = vmax.f32 %v1767_v3, 0.0 }
 0x2ef   : > { %v1769_v6 = vpop.f32.mrf.mxu1 }
 0x2f0   : > { %v1770_v7 = vadd.f32 %v3592_v21, %v1769_v6  ;;  %v2278_v6 = vld [vmem:[%s2853_s19 + $0x40] sm:$0xff] }
 0x2f1   : > { %v1771_v25 = vpop.f32.mrf.mxu1 }
 0x2f2   : > { %v1812_v11 = vmax.f32 %v1770_v7, 0.0 }
 0x2f4   : > { %v1824_v8 = vpack.c.bf16 %v1812_v11, %v1811_v20  ;;  %v2276_v20 = vld [vmem:[%s2853_s19 + $0x30] sm:$0xff] }
 0x2f6   : > { %2356 = vmatmul.mubr.msk.bf16.gmra.mxu0 %vm1683_vm1, %v1824_v8 }
 0x313   : > { %v1774_v57 = vpop.f32.mrf.mxu1 }
 0x314   : > { %v1775_v4 = vadd.f32 %v3592_v21, %v1774_v57 }
 0x315   : > { %v1776_v59 = vpop.f32.mrf.mxu1 }
 0x316   : > { %v1813_v22 = vmax.f32 %v1775_v4, 0.0  ;;  %v2279_v59 = vld [vmem:[%s2853_s19 + $0x48] sm:$0xff] }
 0x317   : > { %v1777_v5 = vpop.f32.mrf.mxu1 }
 0x318   : > { %v1778_v56 = vadd.f32 %v3592_v21, %v1777_v5 }
 0x319   : > { %v1779_v17 = vpop.f32.mrf.mxu1 }
 0x31a   : > { %v1814_v32 = vmax.f32 %v1778_v56, 0.0 }
 0x31b   : > { %v1782_v40 = vpop.f32.mrf.mxu1 }
 0x31c   : > { %v1825_v23 = vpack.c.bf16 %v1814_v32, %v1813_v22  ;;  %v1783_v48 = vadd.f32 %v3592_v21, %v1782_v40  ;;  %v2277_v22 = vld [vmem:[%s2853_s19 + $0x38] sm:$0xff] }
 0x31d   : > { %v1784_v18 = vpop.f32.mrf.mxu1 }
 0x31e   : > { %2359 = vmatprep.mubr.msk.bf16.mxu0 %vm1683_vm1, %v1825_v23  ;;  %v1815_v26 = vmax.f32 %v1783_v48, 0.0 }
 0x31f   : > { %v1785_v24 = vpop.f32.mrf.mxu1 }
 0x320   : > { %v1786_v29 = vadd.f32 %v3592_v21, %v1785_v24 }
 0x321   : > { %v1787_v58 = vpop.f32.mrf.mxu1 }
 0x322   : > { %v1816_v27 = vmax.f32 %v1786_v29, 0.0  ;;  %v2282_v58 = vld [vmem:[%s2853_s19 + $0x60] sm:$0xff] }
 0x324   : > { %v1826_v28 = vpack.c.bf16 %v1816_v27, %v1815_v26 }
 0x326   : > { %2360 = vmatmul.mubr.msk.bf16.gmra.mxu0 %vm1683_vm1, %v1826_v28  ;;  %v2280_v28 = vld [vmem:[%s2853_s19 + $0x50] sm:$0xff] }
 0x32d   : > { %v1790_v30 = vpop.f32.mrf.mxu1 }
 0x32e   : > { %v1791_v42 = vadd.f32 %v3592_v21, %v1790_v30 }
 0x32f   : > { %v1792_v31 = vpop.f32.mrf.mxu1 }
 0x330   : > { %v1817_v16 = vmax.f32 %v1791_v42, 0.0 }
 0x331   : > { %v1793_v45 = vpop.f32.mrf.mxu1 }
 0x332   : > { %v1794_v33 = vadd.f32 %v3592_v21, %v1793_v45  ;;  %v2283_v45 = vld [vmem:[%s2853_s19 + $0x68] sm:$0xff] }
 0x333   : > { %v1795_v0 = vpop.f32.mrf.mxu1 }
 0x334   : > { %v1818_v60 = vmax.f32 %v1794_v33, 0.0 }
 0x335   : > { %v1798_v12 = vpop.f32.mrf.mxu1 }
 0x336   : > { %v1827_v52 = vpack.c.bf16 %v1818_v60, %v1817_v16  ;;  %v1799_v36 = vadd.f32 %v3592_v21, %v1798_v12  ;;  %v2281_v12 = vld [vmem:[%s2853_s19 + $0x58] sm:$0xff] }
 0x337   : > { %v1800_v34 = vpop.f32.mrf.mxu1 }
 0x338   : > { %2363 = vmatprep.mubr.msk.bf16.mxu0 %vm1683_vm1, %v1827_v52  ;;  %v1819_v19 = vmax.f32 %v1799_v36, 0.0 }
 0x339   : > { %v1801_v47 = vpop.f32.mrf.mxu1 }
 0x33a   : > { %v1802_v49 = vadd.f32 %v3592_v21, %v1801_v47 }
 0x33b   : > { %v1803_v37 = vpop.f32.mrf.mxu1 }
 0x33c   : > { %v1820_v38 = vmax.f32 %v1802_v49, 0.0 }
 0x33e   : > { %v1828_v9 = vpack.c.bf16 %v1820_v38, %v1819_v19  ;;  %v2286_v38 = vld [vmem:[%s2853_s19 + $0x80] sm:$0xff] }
 0x340   : > { %2364 = vmatmul.mubr.msk.bf16.gmra.mxu0 %vm1683_vm1, %v1828_v9 }
 0x37c   : > { %v2353_v44 = vpop.f32.mrf.mxu0 }
 0x37d   : > { %v1911_v21 = vadd.f32 %v2353_v44, %v3622_v13 }
 0x37e   : > { %v1902_v41 = vpop.f32.mrf.mxu0 }
 0x37f   : > { %v1986_v14 = vadd.f32 %v2274_v51, %v1911_v21  ;;  %v1903_v15 = vadd.f32 %v3622_v13, %v1902_v41  ;;  %v2284_v51 = vld [vmem:[%s2853_s19 + $0x70] sm:$0xff] }
 0x380   : > { %v2354_v35 = vpop.f32.mrf.mxu0 }
 0x381   : > { %v2002_v39 = vmax.f32 %v1986_v14, 0.0  ;;  %v1984_v61 = vadd.f32 %v2272_v46, %v1903_v15  ;;  %v1914_v62 = vadd.f32 %v2354_v35, %v3622_v13  ;;  %v2287_v14 = vld [vmem:[%s2853_s19 + $0x88] sm:$0xff] }
 0x382   : > { %v1905_v53 = vpop.f32.mrf.mxu0 }
 0x383   : > { %2018 = vst.msk [vmem:[%s3633_s12 + $0x10] sm:$0xff] %vm385_vm0, %v2002_v39  ;;  %v2000_v10 = vmax.f32 %v1984_v61, 0.0  ;;  %v1987_v43 = vadd.f32 %v2275_v50, %v1914_v62  ;;  %v1906_v55 = vadd.f32 %v3622_v13, %v1905_v53  ;;  %v2285_v61 = vld [vmem:[%s2853_s19 + $0x78] sm:$0xff]  ;;  %s3704_s19 = scalar_lea.sflag [#allocation5], %s308_s21 }
 0x385   : > { %2016 = vst.msk [vmem:[%s3633_s12] sm:$0xff] %vm385_vm0, %v2000_v10  ;;  %v2003_v63 = vmax.f32 %v1987_v43, 0.0  ;;  %v1985_v1 = vadd.f32 %v2273_v54, %v1906_v55 }
 0x387   : > { %2019 = vst.msk [vmem:[%s3633_s12 + $0x18] sm:$0xff] %vm385_vm0, %v2003_v63  ;;  %v2001_v2 = vmax.f32 %v1985_v1, 0.0 }
 0x389   : > { %2017 = vst.msk [vmem:[%s3633_s12 + $0x8] sm:$0xff] %vm385_vm0, %v2001_v2 }
 0x3b6   : > { %v2357_v3 = vpop.f32.mrf.mxu0 }
 0x3b7   : > { %v1927_v7 = vadd.f32 %v2357_v3, %v3622_v13 }
 0x3b8   : > { %v1918_v25 = vpop.f32.mrf.mxu0 }
 0x3b9   : > { %v1990_v11 = vadd.f32 %v2278_v6, %v1927_v7  ;;  %v1919_v8 = vadd.f32 %v3622_v13, %v1918_v25 }
 0x3ba   : > { %v2358_v57 = vpop.f32.mrf.mxu0 }
 0x3bb   : > { %v2006_v4 = vmax.f32 %v1990_v11, 0.0  ;;  %v1988_v5 = vadd.f32 %v2276_v20, %v1919_v8  ;;  %v1930_v56 = vadd.f32 %v2358_v57, %v3622_v13 }
 0x3bc   : > { %v1921_v17 = vpop.f32.mrf.mxu0 }
 0x3bd   : > { %2022 = vst.msk [vmem:[%s3633_s12 + $0x30] sm:$0xff] %vm385_vm0, %v2006_v4  ;;  %v2004_v32 = vmax.f32 %v1988_v5, 0.0  ;;  %v1991_v40 = vadd.f32 %v2279_v59, %v1930_v56  ;;  %v1922_v23 = vadd.f32 %v3622_v13, %v1921_v17 }
 0x3bf   : > { %2020 = vst.msk [vmem:[%s3633_s12 + $0x20] sm:$0xff] %vm385_vm0, %v2004_v32  ;;  %v2007_v18 = vmax.f32 %v1991_v40, 0.0  ;;  %v1989_v48 = vadd.f32 %v2277_v22, %v1922_v23 }
 0x3c1   : > { %2023 = vst.msk [vmem:[%s3633_s12 + $0x38] sm:$0xff] %vm385_vm0, %v2007_v18  ;;  %v2005_v24 = vmax.f32 %v1989_v48, 0.0 }
 0x3c3   : > { %2021 = vst.msk [vmem:[%s3633_s12 + $0x28] sm:$0xff] %vm385_vm0, %v2005_v24 }
 0x3e6   : > { %v2361_v29 = vpop.f32.mrf.mxu0 }
 0x3e7   : > { %v1943_v26 = vadd.f32 %v2361_v29, %v3622_v13 }
 0x3e8   : > { %v1934_v27 = vpop.f32.mrf.mxu0 }
 0x3e9   : > { %v1994_v30 = vadd.f32 %v2282_v58, %v1943_v26  ;;  %v1935_v31 = vadd.f32 %v3622_v13, %v1934_v27 }
 0x3ea   : > { %v2362_v42 = vpop.f32.mrf.mxu0 }
 0x3eb   : > { %v2010_v33 = vmax.f32 %v1994_v30, 0.0  ;;  %v1992_v0 = vadd.f32 %v2280_v28, %v1935_v31  ;;  %v1946_v16 = vadd.f32 %v2362_v42, %v3622_v13 }
 0x3ec   : > { %v1937_v60 = vpop.f32.mrf.mxu0 }
 0x3ed   : > { %2026 = vst.msk [vmem:[%s3633_s12 + $0x50] sm:$0xff] %vm385_vm0, %v2010_v33  ;;  %v2008_v52 = vmax.f32 %v1992_v0, 0.0  ;;  %v1995_v34 = vadd.f32 %v2283_v45, %v1946_v16  ;;  %v1938_v36 = vadd.f32 %v3622_v13, %v1937_v60 }
 0x3ef   : > { %2024 = vst.msk [vmem:[%s3633_s12 + $0x40] sm:$0xff] %vm385_vm0, %v2008_v52  ;;  %v2011_v47 = vmax.f32 %v1995_v34, 0.0  ;;  %v1993_v49 = vadd.f32 %v2281_v12, %v1938_v36 }
 0x3f1   : > { %2027 = vst.msk [vmem:[%s3633_s12 + $0x58] sm:$0xff] %vm385_vm0, %v2011_v47  ;;  %v2009_v37 = vmax.f32 %v1993_v49, 0.0 }
 0x3f3   : > { %2025 = vst.msk [vmem:[%s3633_s12 + $0x48] sm:$0xff] %vm385_vm0, %v2009_v37 }
 0x400   : > { %v2365_v19 = vpop.f32.mrf.mxu0 }
 0x401   : > { %v1959_v9 = vadd.f32 %v2365_v19, %v3622_v13 }
 0x402   : > { %v1950_v44 = vpop.f32.mrf.mxu0 }
 0x403   : > { %v1998_v21 = vadd.f32 %v2286_v38, %v1959_v9  ;;  %v1951_v41 = vadd.f32 %v3622_v13, %v1950_v44 }
 0x404   : > { %v2366_v46 = vpop.f32.mrf.mxu0 }
 0x405   : > { %v2014_v15 = vmax.f32 %v1998_v21, 0.0  ;;  %v1996_v35 = vadd.f32 %v2284_v51, %v1951_v41  ;;  %v1962_v50 = vadd.f32 %v2366_v46, %v3622_v13 }
 0x406   : > { %v1953_v39 = vpop.f32.mrf.mxu0 }
 0x407   : > { %2030 = vst.msk [vmem:[%s3633_s12 + $0x70] sm:$0xff] %vm385_vm0, %v2014_v15  ;;  %v2012_v62 = vmax.f32 %v1996_v35, 0.0  ;;  %v1999_v53 = vadd.f32 %v2287_v14, %v1962_v50  ;;  %v1954_v54 = vadd.f32 %v3622_v13, %v1953_v39 }
 0x409   : > { %2028 = vst.msk [vmem:[%s3633_s12 + $0x60] sm:$0xff] %vm385_vm0, %v2012_v62  ;;  %v2015_v10 = vmax.f32 %v1999_v53, 0.0  ;;  %v1997_v43 = vadd.f32 %v2285_v61, %v1954_v54 }
 0x40b   : > { %2031 = vst.msk [vmem:[%s3633_s12 + $0x78] sm:$0xff] %vm385_vm0, %v2015_v10  ;;  %v2013_v55 = vmax.f32 %v1997_v43, 0.0 }
 0x40d   : > { %2029 = vst.msk [vmem:[%s3633_s12 + $0x68] sm:$0xff] %vm385_vm0, %v2013_v55 }
 0x40e   : > { %2560 = shalt.err (!%p2557_p13)
}
 0x40f   : > { %s2561_s21 = scalar_lea.hbm %s3694_s10, 2048  ;;  %s2565_s12 = scalar_lea.hbm %s3771_s7, 8192 }
 0x410   : > { %p2562_p0 = scmp.ne.s32.totalorder %s3694_s10, %s2561_s21  ;;  %p2566_p7 = scmp.lt.s32.totalorder %s3694_s10, %s3771_s7 }
 0x411   : > { %p2567_p4 = scmp.lt.s32.totalorder %s2565_s12, %s2561_s21 }
 0x412   : > { %p2563_p1 = pnand %p2562_p0, %p2805_p12 }
 0x413   : > { %p2568_p5 = por %p2567_p4, %p2566_p7 }
 0x414   : > { %p2564_p6 = pneg %p2563_p1 }
 0x416   : > { %p2569_p8 = pnand %p2568_p5, %p2564_p6 }
 0x418   : > { %2572 = shalt.err (!%p2569_p8)
}
 0x419   : > { %s2681_s20 = smov 128   ;;  %s2682_s30 = smov 8  }
 0x41a   : > { %2372 = dma.vmem_to_hbm [thread:$0]  (%p2805_p12), %s3696_s8, 2048, %s3694_s10, %s3704_s19, %s2681_s20, %s2681_s20, %s2682_s30  }
 0x41b PF: > { %p2383_p9 = scmp.ge.s32.totalorder %s2667_s11, 2  ;;  %s2064_s13 = sand.u32 1, %s2627_s24  }
 0x41c   : > { %s2065_s15 = scalar_lea.sflag [#allocation5], %s2064_s13 }
 0x41d   : > { %p2379_p10 = pnand %p2383_p9, %p2818_p2 }
 0x41f   : > { %p2380_p3 = pneg %p2379_p10 }
 0x421   : > { %2622 = dma.done.wait (%p2380_p3), %s2065_s15, 2048  }
 0x422   : > { %2624 = vsyncadd (%p2380_p3), %s2065_s15, 4294965248  ;;  %s23_s11 = sadd.s32 1, %s2667_s11   ;;  %s3795_s26 = sld [smem:[#allocation9_spill]] }
 0x423   : > { %p20_p11 = scmp.ge.s32.totalorder %s23_s11, 6   ;;  %s3796_s29 = sld [smem:[#allocation16_spill]] }
 0x424   : > { %s3797_s23 = sld [smem:[#allocation10_spill]]  ;;  %s3803_s24 = smov %s2631_s25 }
 0x425   : > { %s3798_s8 = sld [smem:[#allocation15_spill]]  ;;  %s3806_s27 = smov %s2643_s28 }
 0x426   : > { %s3799_s30 = sld [smem:[#allocation11_spill]] }
 0x427   : > { %s3800_s10 = sld [smem:[#allocation12_spill]] }
 0x428   : > { %s3801_s9 = sld [smem:[#allocation13_spill]]  ;;  %s3804_s25 = smov %s3795_s26 }
 0x429   : > { %s3802_s19 = sld [smem:[#allocation14_spill]]  ;;  %s3805_s26 = smov %s3796_s29 }
 0x42a   : > { %s3807_s28 = smov %s3797_s23 }
 0x42b   : > { %s3808_s29 = smov %s3798_s8  ;;  %22 = sbr.rel (!%p20_p11) target bundleno = 9 (0x9), region = 95 }
 0x42d   : > { %s3809_s8 = smov %s3800_s10 }
 0x42f   : > { %s3810_s10 = smov %s3802_s19 }
 0x430   :  { %2070 = vsyncpa [#allocation4], 1 }
 0x431   :  { %2072 = vsyncpa [#allocation4 + $0x1], 1 }
 0x432   :  { %2073 = vsyncpa [#allocation5], 1 }
 0x433   :  { %2075 = vsyncpa [#allocation5 + $0x1], 1 }

</bundles_post_ra>
